<compile_context>
chip_gen: v7x
topology: tpu7x:2x2x1
jax: 0.10.0
libtpu: 0.0.40
codegen_flags: <defaults>
</compile_context>

<pallas_src>
import functools

import jax
import jax.numpy as jnp
from jax.experimental import pallas as pl
from jax.experimental.pallas import tpu as pltpu

LANE = 128


def _round_up(x, m):
    return ((x + m - 1) // m) * m


def label_sage_kernel(adj_ref, inv_deg_ref, feat_ref, wself_ref, wneigh_ref,
                      bs_ref, wp_ref, bp_ref, out_ref, t_ref, *, tm):
    # ---- mean aggregation: full-width int8 stripe against resident feat ----
    # 0/1 mask converts exactly to bf16 on the VPU (free under a DMA/MXU-bound regime);
    # the matmul accumulates in f32 on the MXU.
    adj = adj_ref[...].astype(jnp.bfloat16)                       # (tm, Np)
    neigh_sum = jnp.dot(adj, feat_ref[...],
                        preferred_element_type=jnp.float32)       # (tm, Fin_p) f32
    # exact mean: 1/deg factored out of the matmul, applied in f32
    neigh = neigh_sum * inv_deg_ref[...]                          # (tm, 1) broadcast

    # ---- self rows: dynamic slice of the resident feat (no second HBM stream) ----
    row0 = pl.multiple_of(pl.program_id(0) * tm, tm)
    feat_i = feat_ref[pl.ds(row0, tm), :]                         # (tm, Fin_p) bf16

    # ---- SAGE projection (two dots summed in f32, no concat) + bias + ReLU ----
    h = (jnp.dot(feat_i, wself_ref[...], preferred_element_type=jnp.float32)
         + jnp.dot(neigh.astype(wneigh_ref.dtype), wneigh_ref[...],
                   preferred_element_type=jnp.float32)
         + bs_ref[...])                                           # (tm, Fout_p) f32
    t = jnp.maximum(h, 0.0)                                       # relu_() in f32
    t_ref[...] = t.astype(t_ref.dtype)

    # ---- predictor ----
    out_ref[...] = (jnp.dot(t.astype(wp_ref.dtype), wp_ref[...],
                            preferred_element_type=jnp.float32)
                    + bp_ref[...]).astype(out_ref.dtype)


def pack_graph(adj_mask, *, tm=256):
    """One-time (hoisted) graph packaging: padded 0/1 int8 mask + per-row f32 1/deg."""
    assert tm % LANE == 0, "row stripe must be lane-aligned"
    N = adj_mask.shape[0]
    Np = _round_up(N, tm)
    deg = jnp.sum(adj_mask.astype(jnp.float32), axis=1, keepdims=True)
    inv_deg = jnp.where(deg > 0, 1.0 / jnp.maximum(deg, 1.0), 0.0)
    adj_p = jnp.zeros((Np, Np), jnp.int8).at[:N, :N].set(adj_mask.astype(jnp.int8))
    inv_p = jnp.zeros((Np, 1), jnp.float32).at[:N, :].set(inv_deg)
    return adj_p, inv_p


def pack_params(w_self, w_neigh, b_sage, w_pred, b_pred, *, compute_dtype=jnp.bfloat16):
    """One-time (hoisted) parameter padding to lane-aligned, MXU-friendly layouts."""
    Fin, Fout = w_self.shape
    C = w_pred.shape[1]
    Fin_p, Fout_p, C_p = (_round_up(d, LANE) for d in (Fin, Fout, C))
    ws = jnp.zeros((Fin_p, Fout_p), compute_dtype).at[:Fin, :Fout].set(
        w_self.astype(compute_dtype))
    wn = jnp.zeros((Fin_p, Fout_p), compute_dtype).at[:Fin, :Fout].set(
        w_neigh.astype(compute_dtype))
    bs = jnp.zeros((1, Fout_p), jnp.float32).at[:, :Fout].set(b_sage)
    wp = jnp.zeros((Fout_p, C_p), compute_dtype).at[:Fout, :C].set(
        w_pred.astype(compute_dtype))
    bp = jnp.zeros((1, C_p), jnp.float32).at[:, :C].set(b_pred)
    return ws, wn, bs, wp, bp


def label_sage_forward(adj_i8, inv_deg, feat, packed_params, *,
                       out_feats, cls_num, tm=256, compute_dtype=jnp.bfloat16):
    ws, wn, bs, wp, bp = packed_params
    N, Fin = feat.shape
    Np = adj_i8.shape[0]
    Fin_p, Fout_p = ws.shape
    C_p = wp.shape[1]
    assert Np % tm == 0 and Np % LANE == 0

    # feat padding is per-call (it is the activation) but tiny: N x Fin -> Np x Fin_p bf16
    feat_p = jnp.zeros((Np, Fin_p), compute_dtype).at[:N, :Fin].set(
        feat.astype(compute_dtype))

    grid = (Np // tm,)

    flops = (2 * Np * Np * Fin_p                 # aggregation
             + 2 * Np * Fin_p * Fout_p * 2       # self + neigh projections
             + 2 * Np * Fout_p * C_p)            # predictor
    bytes_accessed = (Np * Np * 1                # int8 adjacency mask, streamed once
                      + Np * Fin_p * 2           # feat (resident, read once)
                      + Np * 4                   # inv_deg
                      + 2 * Fin_p * Fout_p * 2   # W_self + W_neigh
                      + Fout_p * C_p * 2         # W_pred
                      + (Fout_p + C_p) * 4       # biases
                      + Np * (Fout_p + C_p) * 4)  # outputs (f32)

    # rough double-buffered VMEM need; clamp into a portable range
    vmem_need = (2 * tm * Np                     # adj stripe (int8) x2 buffers
                 + 2 * Np * Fin_p * 2            # resident feat (bf16), conservative x2
                 + 2 * tm * 4                    # inv_deg
                 + 2 * (2 * Fin_p * Fout_p + Fout_p * C_p) * 2
                 + 2 * (Fout_p + C_p) * 4
                 + 2 * tm * (Fout_p + C_p) * 4)  # output blocks
    vmem_limit = int(min(max(2 * vmem_need, 32 * 1024 * 1024), 100 * 1024 * 1024))

    out_p, t_p = pl.pallas_call(
        functools.partial(label_sage_kernel, tm=tm),
        out_shape=(
            jax.ShapeDtypeStruct((Np, C_p), jnp.float32),     # out (padded)
            jax.ShapeDtypeStruct((Np, Fout_p), jnp.float32),  # t   (padded)
        ),
        grid=grid,
        in_specs=[
            pl.BlockSpec((tm, Np), lambda i: (i, 0)),          # adjacency stripe (int8 0/1)
            pl.BlockSpec((tm, 1), lambda i: (i, 0)),           # 1/deg rows (f32)
            pl.BlockSpec((Np, Fin_p), lambda i: (0, 0)),       # feat: resident, DMA'd once
            pl.BlockSpec((Fin_p, Fout_p), lambda i: (0, 0)),   # W_self (resident)
            pl.BlockSpec((Fin_p, Fout_p), lambda i: (0, 0)),   # W_neigh (resident)
            pl.BlockSpec((1, Fout_p), lambda i: (0, 0)),       # b_sage (resident)
            pl.BlockSpec((Fout_p, C_p), lambda i: (0, 0)),     # W_pred (resident)
            pl.BlockSpec((1, C_p), lambda i: (0, 0)),          # b_pred (resident)
        ],
        out_specs=(
            pl.BlockSpec((tm, C_p), lambda i: (i, 0)),
            pl.BlockSpec((tm, Fout_p), lambda i: (i, 0)),
        ),
        compiler_params=pltpu.CompilerParams(
            dimension_semantics=("parallel",),
            vmem_limit_bytes=vmem_limit,
        ),
        cost_estimate=pl.CostEstimate(
            flops=flops, transcendentals=0, bytes_accessed=bytes_accessed),
    )(adj_i8, inv_deg, feat_p, ws, wn, bs, wp, bp)

    # slice padding off (out-of-kernel, cheap)
    return out_p[:N, :cls_num], t_p[:N, :out_feats]


def reference_forward(adj_norm, feat, w_self, w_neigh, b_sage, w_pred, b_pred):
    neigh = adj_norm @ feat
    t = jnp.maximum(feat @ w_self + neigh @ w_neigh + b_sage, 0.0)
    out = t @ w_pred + b_pred
    return out, t


if __name__ == "__main__":
    # Small deterministic problem; 2 row stripes so the parallel axis can shard
    # across both TensorCores on v7x.
    N = 512
    in_feats = 16
    out_feats = 32
    cls_num = 4
    tm = 256

    key = jax.random.PRNGKey(0)
    k_feat, k_adj, k_ws, k_wn, k_bs, k_wp, k_bp = jax.random.split(key, 7)

    feat = jax.random.normal(k_feat, (N, in_feats), dtype=jnp.float32)

    # deterministic random 0/1 graph with self-loops (mean aggregation, deg >= 1)
    adj_mask = (jax.random.uniform(k_adj, (N, N)) < 0.1).astype(jnp.float32)
    adj_mask = jnp.maximum(adj_mask, jnp.eye(N, dtype=jnp.float32))
    deg = jnp.sum(adj_mask, axis=1, keepdims=True)
    adj_norm = adj_mask / deg                     # f32 reference adjacency

    # parameters (deterministic init, shapes per SAGEConv / nn.Linear)
    w_self = jax.random.normal(k_ws, (in_feats, out_feats), dtype=jnp.float32) * 0.1
    w_neigh = jax.random.normal(k_wn, (in_feats, out_feats), dtype=jnp.float32) * 0.1
    b_sage = jax.random.normal(k_bs, (1, out_feats), dtype=jnp.float32) * 0.1
    w_pred = jax.random.normal(k_wp, (out_feats, cls_num), dtype=jnp.float32) * 0.1
    b_pred = jax.random.normal(k_bp, (1, cls_num), dtype=jnp.float32) * 0.1

    # one-time (hoisted) packaging of graph + parameters; forward path is kernel-only
    adj_i8, inv_deg = pack_graph(adj_mask, tm=tm)
    packed = pack_params(w_self, w_neigh, b_sage, w_pred, b_pred)

    out, t = label_sage_forward(adj_i8, inv_deg, feat, packed,
                                out_feats=out_feats, cls_num=cls_num, tm=tm)
    jax.block_until_ready((out, t))

    out_ref, t_ref = reference_forward(adj_norm, feat, w_self, w_neigh,
                                       b_sage, w_pred, b_pred)
    assert out.shape == (N, cls_num) and t.shape == (N, out_feats)
    # bf16 MXU operands (f32 accumulation, exact 1/deg) -> relaxed tolerance vs f32 ref
    assert jnp.allclose(out, out_ref, atol=2e-2, rtol=2e-2)
    assert jnp.allclose(t, t_ref, atol=2e-2, rtol=2e-2)

    print("KERNEL_OK")
</pallas_src>

<mosaic_0001>
module attributes {stable_mosaic.version = 11 : i64} {
  func.func @label_sage_kernel(%arg0: i32, %arg1: memref<256x512xi8, #tpu.memory_space<vmem>>, %arg2: memref<256x1xf32, #tpu.memory_space<vmem>>, %arg3: memref<512x128xbf16, #tpu.memory_space<vmem>>, %arg4: memref<128x128xbf16, #tpu.memory_space<vmem>>, %arg5: memref<128x128xbf16, #tpu.memory_space<vmem>>, %arg6: memref<1x128xf32, #tpu.memory_space<vmem>>, %arg7: memref<128x128xbf16, #tpu.memory_space<vmem>>, %arg8: memref<1x128xf32, #tpu.memory_space<vmem>>, %arg9: memref<256x128xf32, #tpu.memory_space<vmem>>, %arg10: memref<256x128xf32, #tpu.memory_space<vmem>>) attributes {dimension_semantics = [#tpu.dimension_semantics<parallel>], iteration_bounds = array<i64: 2>, scalar_prefetch = 0 : i64, scratch_operands = 0 : i64, tpu.core_type = #tpu.core_type<tc>, window_params = [{transform_indices = @transform_0, window_bounds = array<i64: 256, 512>}, {transform_indices = @transform_1, window_bounds = array<i64: 256, 1>}, {pipeline_mode = #tpu.pipeline_mode<synchronous>, transform_indices = @transform_2, window_bounds = array<i64: 512, 128>}, {pipeline_mode = #tpu.pipeline_mode<synchronous>, transform_indices = @transform_3, window_bounds = array<i64: 128, 128>}, {pipeline_mode = #tpu.pipeline_mode<synchronous>, transform_indices = @transform_4, window_bounds = array<i64: 128, 128>}, {pipeline_mode = #tpu.pipeline_mode<synchronous>, transform_indices = @transform_5, window_bounds = array<i64: 1, 128>}, {pipeline_mode = #tpu.pipeline_mode<synchronous>, transform_indices = @transform_6, window_bounds = array<i64: 128, 128>}, {pipeline_mode = #tpu.pipeline_mode<synchronous>, transform_indices = @transform_7, window_bounds = array<i64: 1, 128>}, {transform_indices = @transform_8, window_bounds = array<i64: 256, 128>}, {transform_indices = @transform_9, window_bounds = array<i64: 256, 128>}]} {
    %c0 = arith.constant 0 : index
    %c0_0 = arith.constant 0 : index
    %0 = vector.load %arg1[%c0, %c0_0] : memref<256x512xi8, #tpu.memory_space<vmem>>, vector<256x512xi8>
    %1 = arith.sitofp %0 : vector<256x512xi8> to vector<256x512xbf16>
    %c0_1 = arith.constant 0 : index
    %c0_2 = arith.constant 0 : index
    %2 = vector.load %arg3[%c0_1, %c0_2] : memref<512x128xbf16, #tpu.memory_space<vmem>>, vector<512x128xbf16>
    %cst = arith.constant dense<0.000000e+00> : vector<256x128xf32>
    %3 = tpu.matmul %1, %2, %cst {dimension_numbers = #tpu.dot_dimension_numbers<[1], [0], [0], [1], [0, 0, 1, 1], [], []>} : vector<256x512xbf16>, vector<512x128xbf16>, vector<256x128xf32> -> vector<256x128xf32>
    %c0_3 = arith.constant 0 : index
    %c0_4 = arith.constant 0 : index
    %4 = vector.load %arg2[%c0_3, %c0_4] : memref<256x1xf32, #tpu.memory_space<vmem>>, vector<256x1xf32>
    %5 = vector.broadcast %4 : vector<256x1xf32> to vector<256x128xf32>
    %6 = arith.mulf %3, %5 : vector<256x128xf32>
    %c256_i32 = arith.constant 256 : i32
    %7 = arith.muli %arg0, %c256_i32 : i32
    %8 = tpu.assume_multiple %7, 256 : i32
    %9 = arith.index_cast %8 : i32 to index
    %c0_5 = arith.constant 0 : index
    %10 = vector.load %arg3[%9, %c0_5] : memref<512x128xbf16, #tpu.memory_space<vmem>>, vector<256x128xbf16>
    %c0_6 = arith.constant 0 : index
    %c0_7 = arith.constant 0 : index
    %11 = vector.load %arg4[%c0_6, %c0_7] : memref<128x128xbf16, #tpu.memory_space<vmem>>, vector<128x128xbf16>
    %cst_8 = arith.constant dense<0.000000e+00> : vector<256x128xf32>
    %12 = tpu.matmul %10, %11, %cst_8 {dimension_numbers = #tpu.dot_dimension_numbers<[1], [0], [0], [1], [0, 0, 1, 1], [], []>} : vector<256x128xbf16>, vector<128x128xbf16>, vector<256x128xf32> -> vector<256x128xf32>
    %13 = arith.truncf %6 : vector<256x128xf32> to vector<256x128xbf16>
    %c0_9 = arith.constant 0 : index
    %c0_10 = arith.constant 0 : index
    %14 = vector.load %arg5[%c0_9, %c0_10] : memref<128x128xbf16, #tpu.memory_space<vmem>>, vector<128x128xbf16>
    %cst_11 = arith.constant dense<0.000000e+00> : vector<256x128xf32>
    %15 = tpu.matmul %13, %14, %cst_11 {dimension_numbers = #tpu.dot_dimension_numbers<[1], [0], [0], [1], [0, 0, 1, 1], [], []>} : vector<256x128xbf16>, vector<128x128xbf16>, vector<256x128xf32> -> vector<256x128xf32>
    %16 = arith.addf %12, %15 : vector<256x128xf32>
    %c0_12 = arith.constant 0 : index
    %c0_13 = arith.constant 0 : index
    %17 = vector.load %arg6[%c0_12, %c0_13] : memref<1x128xf32, #tpu.memory_space<vmem>>, vector<1x128xf32>
    %18 = vector.broadcast %17 : vector<1x128xf32> to vector<256x128xf32>
    %19 = arith.addf %16, %18 : vector<256x128xf32>
    %cst_14 = arith.constant 0.000000e+00 : f32
    %20 = vector.broadcast %cst_14 : f32 to vector<256x128xf32>
    %21 = arith.maximumf %19, %20 : vector<256x128xf32>
    %c0_15 = arith.constant 0 : index
    %c0_16 = arith.constant 0 : index
    %22 = vector.load %arg10[%c0_15, %c0_16] : memref<256x128xf32, #tpu.memory_space<vmem>>, vector<256x128xf32>
    tpu.vector_store %arg10[%c0_15, %c0_16], %21 {strides = array<i32>} : memref<256x128xf32, #tpu.memory_space<vmem>>, vector<256x128xf32>,
    %23 = arith.truncf %21 : vector<256x128xf32> to vector<256x128xbf16>
    %c0_17 = arith.constant 0 : index
    %c0_18 = arith.constant 0 : index
    %24 = vector.load %arg7[%c0_17, %c0_18] : memref<128x128xbf16, #tpu.memory_space<vmem>>, vector<128x128xbf16>
    %cst_19 = arith.constant dense<0.000000e+00> : vector<256x128xf32>
    %25 = tpu.matmul %23, %24, %cst_19 {dimension_numbers = #tpu.dot_dimension_numbers<[1], [0], [0], [1], [0, 0, 1, 1], [], []>} : vector<256x128xbf16>, vector<128x128xbf16>, vector<256x128xf32> -> vector<256x128xf32>
    %c0_20 = arith.constant 0 : index
    %c0_21 = arith.constant 0 : index
    %26 = vector.load %arg8[%c0_20, %c0_21] : memref<1x128xf32, #tpu.memory_space<vmem>>, vector<1x128xf32>
    %27 = vector.broadcast %26 : vector<1x128xf32> to vector<256x128xf32>
    %28 = arith.addf %25, %27 : vector<256x128xf32>
    %c0_22 = arith.constant 0 : index
    %c0_23 = arith.constant 0 : index
    %29 = vector.load %arg9[%c0_22, %c0_23] : memref<256x128xf32, #tpu.memory_space<vmem>>, vector<256x128xf32>
    tpu.vector_store %arg9[%c0_22, %c0_23], %28 {strides = array<i32>} : memref<256x128xf32, #tpu.memory_space<vmem>>, vector<256x128xf32>,
    return
  }
  func.func @transform_0(%arg0: i32) -> (i32, i32) {
    %c0_i32 = arith.constant 0 : i32
    %c0_i32_0 = arith.constant 0 : i32
    return %arg0, %c0_i32 : i32, i32
  }
  func.func @transform_1(%arg0: i32) -> (i32, i32) {
    %c0_i32 = arith.constant 0 : i32
    %c0_i32_0 = arith.constant 0 : i32
    return %arg0, %c0_i32 : i32, i32
  }
  func.func @transform_2(%arg0: i32) -> (i32, i32) {
    %c0_i32 = arith.constant 0 : i32
    %c0_i32_0 = arith.constant 0 : i32
    %c0_i32_1 = arith.constant 0 : i32
    return %c0_i32, %c0_i32_0 : i32, i32
  }
  func.func @transform_3(%arg0: i32) -> (i32, i32) {
    %c0_i32 = arith.constant 0 : i32
    %c0_i32_0 = arith.constant 0 : i32
    %c0_i32_1 = arith.constant 0 : i32
    return %c0_i32, %c0_i32_0 : i32, i32
  }
  func.func @transform_4(%arg0: i32) -> (i32, i32) {
    %c0_i32 = arith.constant 0 : i32
    %c0_i32_0 = arith.constant 0 : i32
    %c0_i32_1 = arith.constant 0 : i32
    return %c0_i32, %c0_i32_0 : i32, i32
  }
  func.func @transform_5(%arg0: i32) -> (i32, i32) {
    %c0_i32 = arith.constant 0 : i32
    %c0_i32_0 = arith.constant 0 : i32
    %c0_i32_1 = arith.constant 0 : i32
    return %c0_i32, %c0_i32_0 : i32, i32
  }
  func.func @transform_6(%arg0: i32) -> (i32, i32) {
    %c0_i32 = arith.constant 0 : i32
    %c0_i32_0 = arith.constant 0 : i32
    %c0_i32_1 = arith.constant 0 : i32
    return %c0_i32, %c0_i32_0 : i32, i32
  }
  func.func @transform_7(%arg0: i32) -> (i32, i32) {
    %c0_i32 = arith.constant 0 : i32
    %c0_i32_0 = arith.constant 0 : i32
    %c0_i32_1 = arith.constant 0 : i32
    return %c0_i32, %c0_i32_0 : i32, i32
  }
  func.func @transform_8(%arg0: i32) -> (i32, i32) {
    %c0_i32 = arith.constant 0 : i32
    %c0_i32_0 = arith.constant 0 : i32
    return %arg0, %c0_i32 : i32, i32
  }
  func.func @transform_9(%arg0: i32) -> (i32, i32) {
    %c0_i32 = arith.constant 0 : i32
    %c0_i32_0 = arith.constant 0 : i32
    return %arg0, %c0_i32 : i32, i32
  }
}

</mosaic_0001>

<bundles_post_ra>
// kernel: tpu_custom_call.1
= control target key start
LH: loop header
LB: loop body
LE: loop exit
PB: predicated region body
PF: predicated region fallthrough
CT: control target
= control target key end

     0   :  { %15 = vsyncpa [#allocation3], 0  ;;  %s4141_s0 = inlined_call_operand.vmem [shape: s8[512,512], index: 0, kind: input, shape index: {}]   ;;  %s4142_s1 = inlined_call_operand.vmem [shape: f32[512,1], index: 1, kind: input, shape index: {}]   ;;  %s4143_s2 = inlined_call_operand.hbm [shape: bf16[512,128], index: 2, kind: input, shape index: {}]   ;;  %s4144_s3 = inlined_call_operand.hbm [shape: bf16[128,128], index: 3, kind: input, shape index: {}]   ;;  %s4145_s4 = inlined_call_operand.hbm [shape: bf16[128,128], index: 4, kind: input, shape index: {}]   ;;  %s4146_s5 = inlined_call_operand.vmem [shape: f32[1,128], index: 5, kind: input, shape index: {}]   ;;  %s4147_s6 = inlined_call_operand.hbm [shape: bf16[128,128], index: 6, kind: input, shape index: {}]   ;;  %s4148_s7 = inlined_call_operand.vmem [shape: f32[1,128], index: 7, kind: input, shape index: {}]   ;;  %s4149_s8 = inlined_call_operand.hbm [shape: f32[512,128], index: 8, kind: output, shape index: {0}]   ;;  %s4150_s9 = inlined_call_operand.hbm [shape: f32[512,128], index: 9, kind: output, shape index: {1}]  }
   0x1   :  { %16 = vsyncpa [#allocation6], 0 }
   0x2   :  { %17 = vsyncpa [#allocation9], 0 }
   0x3   :  { %18 = vsyncpa [#allocation4], 0 }
   0x4   :  { %20 = vsyncpa [#allocation4 + $0x1], 0 }
   0x5   :  { %21 = vsyncpa [#allocation12], 0 }
   0x6   :  { %23 = vsyncpa [#allocation12 + $0x1], 0  ;;  %s3534_s30 = smov 0   ;;  %s3536_s10 = smov 0  }
   0x7   :  { %s3538_s11 = smov 0   ;;  %s3540_s12 = smov 0  }
   0x8 LB: > { %4159 = sst [smem:[#allocation18_spill]] %s3459_s30  ;;  %s3555_s13 = sadd.s32 4294967295, %s3471_s12   ;;  %s3471_s12 = sphi %s3540_s12, %s4180_s12   ;;  %s3467_s11 = sphi %s3538_s11, %s4182_s11   ;;  %s3463_s10 = sphi %s3536_s10, %s4184_s10   ;;  %s3459_s30 = sphi %s3534_s30, %s4183_s30  }
   0x9   : > { %4160 = sst [smem:[#allocation19_spill]] %s3467_s11  ;;  %s2495_s14 = sadd.s32 4294967294, %s3471_s12  }
   0xa   : > { %s3559_s15 = sadd.s32 1, %s3471_s12   ;;  %s214_s16 = sadd.s32 1, %s3467_s11 }
   0xb   : > { %4161 = sst [smem:[#allocation20_spill]] %s3559_s15  ;;  %s211_s17 = ssub.s32 %s3471_s12, %s3559_s15 }
   0xc   : > { %p224_p0 = scmp.ne.s32.totalorder %s3467_s11, %s3463_s10  ;;  %p212_p1 = scmp.eq.s32.totalorder %s211_s17, 0 }
   0xd   : > { %p225_p2 = scmp.eq.s32.totalorder %s3555_s13, 1  ;;  %p230_p3 = scmp.ne.s32.totalorder %s3463_s10, %s3459_s30 }
   0xe   : > { %p231_p4 = scmp.eq.s32.totalorder %s2495_s14, 1  ;;  %p2496_p7 = scmp.ge.s32.totalorder %s3471_s12, 1 }
   0xf   : > { %s3570_s18 = scalar_select %p212_p1, %s3467_s11, %s214_s16  }
  0x10   : > { %p3572_p5 = por %p225_p2, %p224_p0  ;;  %p3576_p6 = por %p231_p4, %p230_p3 }
  0x11   : > { %4162 = sst [smem:[#allocation21_spill]] %s3570_s18  ;;  %p264_p8 = scmp.lt.s32.totalorder %s3471_s12, 3 }
  0x12   : > { %s4163_s19 = scalar_select %p3572_p5, 1, 0 }
  0x13   : > { %s4164_s20 = scalar_select %p3576_p6, 1, 0 }
  0x14   : > { %p4151_p9 = scmp.eq.s32.totalorder %s3555_s13, 0  ;;  %p3583_p10 = pnand %p2496_p7, %p264_p8 }
  0x15   : > { %4165 = sst [smem:[#allocation22_spill]] %s4164_s20  ;;  %s3473_s22 = smov [#allocation5]  }
  0x16   : > { %s4166_s21 = scalar_select %p3583_p10, 1, 0 }
  0x17   : > { %p3109_p11 = pneg %p3583_p10  ;;  %s289_s23 = sshll.u32 %s3473_s22, 4  ;;  %s3589_s23 = int_to_ptr.vmem [resolvable:$true] %s289_s23 }
  0x18   : > { %s3474_s25 = smov [#allocation2]   ;;  %s3475_s27 = smov [#allocation7]  }
  0x19   : > { %p3593_p12 = pnand %p4151_p9, %p3109_p11  ;;  %s276_s26 = sshll.u32 %s3474_s25, 4  ;;  %s3597_s26 = int_to_ptr.vmem [resolvable:$true] %s276_s26 }
  0x1a   : > { %s3599_s28 = sshll.u32 %s3475_s27, 4  ;;  %s3253_s16 = scalar_lea.hbm %s4144_s3, 1024  ;;  %s303_s28 = int_to_ptr.vmem [resolvable:$true] %s3599_s28 }
  0x1b   : > { %p3254_p13 = scmp.ne.s32.totalorder %s4144_s3, %s3253_s16  ;;  %p3609_p0 = pneg %p3593_p12 }
  0x1c   : > { %p3260_p3 = scmp.lt.u32.totalorder %s3253_s16, %s4144_s3 }
  0x1d   : > { %p3256_p1 = pnand %p3609_p0, %p3254_p13 }
  0x1f   : > { %p3257_p2 = pneg %p3256_p1 }
  0x21   : > { %p3262_p4 = pnand %p3260_p3, %p3257_p2 }
  0x23   : > { %3265 = shalt.err (!%p3262_p4)
}
  0x24   : > { %s3266_s29 = scalar_lea.vmem %s3589_s23, 1024  ;;  %p3274_p9 = scmp.lt.s32.totalorder %s3589_s23, %s3589_s23 }
  0x25   : > { %p3267_p7 = scmp.ne.s32.totalorder %s3589_s23, %s3266_s29  ;;  %p3275_p6 = scmp.lt.s32.totalorder %s3266_s29, %s3266_s29 }
  0x27   : > { %p3269_p8 = pnand %p3267_p7, %p3609_p0  ;;  %p3276_p13 = por %p3275_p6, %p3274_p9 }
  0x29   : > { %p3270_p11 = pneg %p3269_p8 }
  0x2b   : > { %p3277_p1 = pnand %p3276_p13, %p3270_p11 }
  0x2d   : > { %3280 = shalt.err (!%p3277_p1)
}
  0x2e   : > { %s3476_s14 = smov 64   ;;  %s3477_s16 = smov 4  }
  0x2f   : > { %3115 = dma.hbm_to_vmem [thread:$0]  (!%p3593_p12), %s4144_s3, 1024, %s3589_s23, [#allocation6], %s3476_s14, %s3476_s14, %s3477_s16  }
  0x30   : > { %s3281_s29 = scalar_lea.hbm %s4143_s2, 4096 }
  0x31   : > { %p3282_p6 = scmp.ne.s32.totalorder %s4143_s2, %s3281_s29  ;;  %p3288_p3 = scmp.lt.u32.totalorder %s3281_s29, %s4143_s2 }
  0x33   : > { %p3284_p9 = pnand %p3282_p6, %p3609_p0 }
  0x35   : > { %p3285_p2 = pneg %p3284_p9 }
  0x37   : > { %p3290_p4 = pnand %p3288_p3, %p3285_p2 }
  0x39   : > { %3293 = shalt.err (!%p3290_p4)
}
  0x3a   : > { %s3294_s23 = scalar_lea.vmem %s3597_s26, 4096  ;;  %p3302_p13 = scmp.lt.s32.totalorder %s3597_s26, %s3597_s26 }
  0x3b   : > { %p3295_p7 = scmp.ne.s32.totalorder %s3597_s26, %s3294_s23  ;;  %p3303_p1 = scmp.lt.s32.totalorder %s3294_s23, %s3294_s23 }
  0x3d   : > { %p3297_p8 = pnand %p3295_p7, %p3609_p0  ;;  %p3304_p6 = por %p3303_p1, %p3302_p13 }
  0x3f   : > { %p3298_p11 = pneg %p3297_p8 }
  0x41   : > { %p3305_p9 = pnand %p3304_p6, %p3298_p11 }
  0x43   : > { %3308 = shalt.err (!%p3305_p9)
}
  0x44   : > { %3112 = dma.hbm_to_vmem [thread:$0]  (!%p3593_p12), %s4143_s2, 4096, %s3597_s26, [#allocation3], %s3476_s14, %s3476_s14, %s3477_s16  }
  0x45   : > { %s3309_s17 = scalar_lea.hbm %s4145_s4, 1024 }
  0x46   : > { %p3310_p2 = scmp.ne.s32.totalorder %s4145_s4, %s3309_s17  ;;  %p3316_p7 = scmp.lt.u32.totalorder %s3309_s17, %s4145_s4 }
  0x48   : > { %p3312_p3 = pnand %p3310_p2, %p3609_p0 }
  0x4a   : > { %p3313_p4 = pneg %p3312_p3 }
  0x4c   : > { %p3318_p8 = pnand %p3316_p7, %p3313_p4 }
  0x4e   : > { %3321 = shalt.err (!%p3318_p8)
}
  0x4f   : > { %s3322_s23 = scalar_lea.vmem %s303_s28, 1024  ;;  %p3330_p6 = scmp.lt.s32.totalorder %s303_s28, %s303_s28 }
  0x50   : > { %p3323_p11 = scmp.ne.s32.totalorder %s303_s28, %s3322_s23  ;;  %p3331_p9 = scmp.lt.s32.totalorder %s3322_s23, %s3322_s23 }
  0x52   : > { %p3325_p13 = pnand %p3323_p11, %p3609_p0  ;;  %p3332_p5 = por %p3331_p9, %p3330_p6 }
  0x54   : > { %p3326_p1 = pneg %p3325_p13 }
  0x56   : > { %p3333_p10 = pnand %p3332_p5, %p3326_p1 }
  0x58   : > { %3336 = shalt.err (!%p3333_p10)
}
  0x59   : > { %3118 = dma.hbm_to_vmem [thread:$0]  (!%p3593_p12), %s4145_s4, 1024, %s303_s28, [#allocation6], %s3476_s14, %s3476_s14, %s3477_s16  }
  0x5a   : > { %s3478_s11 = smov [#allocation8]   ;;  %s3337_s22 = scalar_lea.hbm %s4147_s6, 1024 }
  0x5b   : > { %s318_s15 = sshll.u32 %s3478_s11, 4  ;;  %p3338_p5 = scmp.ne.s32.totalorder %s4147_s6, %s3337_s22  ;;  %s319_s15 = int_to_ptr.vmem [resolvable:$true] %s318_s15 }
  0x5c   : > { %p3344_p3 = scmp.lt.u32.totalorder %s3337_s22, %s4147_s6 }
  0x5d   : > { %p3340_p10 = pnand %p3338_p5, %p3609_p0 }
  0x5f   : > { %p3341_p2 = pneg %p3340_p10 }
  0x61   : > { %p3346_p4 = pnand %p3344_p3, %p3341_p2 }
  0x63   : > { %3349 = shalt.err (!%p3346_p4)
}
  0x64   : > { %s3350_s28 = scalar_lea.vmem %s319_s15, 1024  ;;  %p3358_p13 = scmp.lt.s32.totalorder %s319_s15, %s319_s15 }
  0x65   : > { %p3351_p7 = scmp.ne.s32.totalorder %s319_s15, %s3350_s28  ;;  %p3359_p1 = scmp.lt.s32.totalorder %s3350_s28, %s3350_s28 }
  0x67   : > { %p3353_p8 = pnand %p3351_p7, %p3609_p0  ;;  %p3360_p6 = por %p3359_p1, %p3358_p13 }
  0x69   : > { %p3354_p11 = pneg %p3353_p8 }
  0x6b   : > { %p3361_p9 = pnand %p3360_p6, %p3354_p11 }
  0x6d   : > { %3364 = shalt.err (!%p3361_p9)
}
  0x6e   : > { %3121 = dma.hbm_to_vmem [thread:$0]  (!%p3593_p12), %s4147_s6, 1024, %s319_s15, [#allocation9], %s3476_s14, %s3476_s14, %s3477_s16  }
  0x6f   : > { %p4169_p5 = scmp.ne.s32.totalorder %s4166_s21, 0 }
  0x70   : > { %p4170_p0 = scmp.eq.s32.totalorder (!%p4169_p5), %s3555_s13, 0 }
  0x71   : > { %356 = sbr.rel (%p4169_p5) target bundleno = 1052 (0x41c), region = 52 }
  0x78   : > { %3438 = dma.done.wait (%p4170_p0), [#allocation3], 4096   ;;  %p4171_p10 = pmov %p4170_p0 }
  0x79   : > { %p4172_p2 = pmov %p4170_p0 }
  0x7a   : > { %3440 = vsyncadd (%p4171_p10), [#allocation3], 4294963200 }
  0x7b   : > { %3442 = dma.done.wait (%p4172_p2), [#allocation6], 2048   ;;  %p4173_p3 = pmov %p4170_p0 }
  0x7c   : > { %p4174_p4 = pmov %p4170_p0 }
  0x7d   : > { %3444 = vsyncadd (%p4173_p3), [#allocation6], 4294965248 }
  0x7e   : > { %3446 = dma.done.wait (%p4174_p4), [#allocation9], 1024   ;;  %p4175_p12 = pmov %p4170_p0 }
  0x7f   : > { %s2509_s18 = sshll.u32 %s3555_s13, 3  ;;  %v3181_v0 = vld [vmem:[#allocation2 + $0x40] sm:$0xff]   ;;  %v3183_v2 = vld [vmem:[#allocation2 + $0x48] sm:$0xff]   ;;  %v3185_v4 = vld [vmem:[#allocation2 + $0x50] sm:$0xff]   ;;  %v3479_v15 = vmov 0   ;;  %s2512_s11 = sshll.u32 %s3555_s13, 5 }
  0x80   : > { %3448 = vsyncadd (%p4175_p12), [#allocation9], 4294966272  ;;  %v3182_v1 = vld [vmem:[#allocation2] sm:$0xff]   ;;  %3041 = vmatprep.subr.bf16.mxu1 %v3181_v0  ;;  %p416_p7 = scmp.lt.s32.totalorder %s2509_s18, 15  ;;  %2601 = vmatprep.subr.bf16.mxu0 %v3181_v0  ;;  %v3184_v3 = vld [vmem:[#allocation2 + $0x8] sm:$0xff]   ;;  %p423_p8 = scmp.lt.s32.totalorder %s2512_s11, 63 }
  0x81   : > { %3049 = vmatpush3.bf16.msra.mxu1 %v3182_v1  ;;  %2602 = vmatpush3.bf16.msra.mxu0 %v3182_v1  ;;  %v3186_v5 = vld [vmem:[#allocation2 + $0x10] sm:$0xff]   ;;  %v3187_v6 = vld [vmem:[#allocation2 + $0x58] sm:$0xff]   ;;  %v3189_v8 = vld [vmem:[#allocation2 + $0x60] sm:$0xff]   ;;  %s2546_s25 = sshll.u32 %s3555_s13, 8  ;;  %s3900_s28 = sand.u32 1, %s3463_s10  }
  0x82   : > { %3042 = vmatprep.subr.bf16.mxu1 %v3183_v2  ;;  %2603 = vmatprep.subr.bf16.mxu0 %v3183_v2  ;;  %s4186_s18 = smov (!%p416_p7, %s2509_s18), 15  ;;  %v3188_v7 = vld [vmem:[#allocation2 + $0x18] sm:$0xff]   ;;  %v3190_v9 = vld [vmem:[#allocation2 + $0x20] sm:$0xff]   ;;  %v3191_v10 = vld [vmem:[#allocation2 + $0x68] sm:$0xff]   ;;  %s4188_s11 = smov (!%p423_p8, %s2512_s11), 63 }
  0x83   : > { %s2598_s21 = sshll.u32 %s4186_s18, 5  ;;  %v3192_v13 = vld [vmem:[#allocation2 + $0x28] sm:$0xff]   ;;  %v3193_v14 = vld [vmem:[#allocation2 + $0x70] sm:$0xff]   ;;  %3179 = vset.pattern.permute.xlu0 %v3479_v15  ;;  %3180 = vset.pattern.permute.xlu1 %v3479_v15  ;;  %v3195_v17 = vld [vmem:[#allocation2 + $0x78] sm:$0xff]   ;;  %s2513_s15 = sshll.u32 %s4188_s11, 3 }
  0x84   : > { %s3720_s16 = scalar_lea.vmem %s4141_s0, %s2598_s21  ;;  %v3194_v16 = vld [vmem:[#allocation2 + $0x30] sm:$0xff]   ;;  %v3196_v18 = vld [vmem:[#allocation2 + $0x38] sm:$0xff]   ;;  %v3197_v20 = vld [vmem:[#allocation2 + $0xc0] sm:$0xff]   ;;  %s3731_s22 = scalar_lea.vmem %s4142_s1, %s2513_s15 }
  0x85   : > { %3050 = vmatpush3.bf16.msra.mxu1 %v3184_v3  ;;  %2604 = vmatpush3.bf16.msra.mxu0 %v3184_v3  ;;  %v456_v11 = vld [vmem:[%s3720_s16 + $0xc8] sm:$0xff]  ;;  %v455_v19 = vld [vmem:[%s3720_s16 + $0xc0] sm:$0xff]  ;;  %v3201_v31 = vld [vmem:[#allocation2 + $0xd0] sm:$0xff]   ;;  %s1330_s27 = sshra.s32 %s2546_s25, 3  ;;  %s2507_s18 = sshll.u32 %s3900_s28, 8 }
  0x86   : > { %3043 = vmatprep.subr.bf16.mxu1 %v3185_v4  ;;  %2605 = vmatprep.subr.bf16.mxu0 %v3185_v4  ;;  %v512_v12 = vunpack.c.l.s8.bf16 %v456_v11  ;;  %v511_v21 = vunpack.c.l.s8.bf16 %v455_v19  ;;  %v516_v22 = vunpack.c.h.s8.bf16 %v456_v11  ;;  %v3198_v23 = vld [vmem:[#allocation2 + $0x80] sm:$0xff]   ;;  %v3199_v24 = vld [vmem:[#allocation2 + $0xc8] sm:$0xff]   ;;  %v515_v33 = vunpack.c.h.s8.bf16 %v455_v19  ;;  %v3202_v34 = vld [vmem:[#allocation2 + $0x90] sm:$0xff]   ;;  %s2547_s29 = sshll.u32 %s1330_s27, 2  ;;  %s3914_s21 = scalar_lea.vmem [#allocation11], %s2507_s18 }
  0x87   : > { %v432_v25 = vld [vmem:[%s3720_s16 + $0x8] sm:$0xff]  ;;  %v431_v28 = vld [vmem:[%s3720_s16] sm:$0xff]  ;;  %v3203_v37 = vld [vmem:[#allocation2 + $0xd8] sm:$0xff]   ;;  %s3824_s23 = scalar_lea.vmem [#allocation2], %s2547_s29  ;;  %s2599_s24 = sshll.u32 %s3555_s13, 12 }
  0x88   : > { %911 = vmatprep.mubr.bf16.mxu1 %v512_v12  ;;  %v464_v26 = vunpack.c.l.s8.bf16 %v432_v25  ;;  %v468_v27 = vunpack.c.h.s8.bf16 %v432_v25  ;;  %v3200_v29 = vld [vmem:[#allocation2 + $0x88] sm:$0xff]   ;;  %v463_v30 = vunpack.c.l.s8.bf16 %v431_v28  ;;  %v467_v38 = vunpack.c.h.s8.bf16 %v431_v28  ;;  %v1105_v39 = vld [vmem:[%s3731_s22] sm:$0xff]  ;;  %v1107_v41 = vld [vmem:[%s3731_s22 + $0x10] sm:$0xff]  ;;  %s3982_s11 = scalar_lea.hbm %s4150_s9, %s2599_s24  ;;  %s2346_s15 = sshll.u32 %s3914_s21, 4  ;;  %s3985_s15 = int_to_ptr.vmem [resolvable:$true] %s2346_s15 }
  0x89   : > { %3051 = vmatpush3.bf16.msra.mxu1 %v3186_v5  ;;  %2606 = vmatpush3.bf16.msra.mxu0 %v3186_v5  ;;  %v460_v32 = vld [vmem:[%s3720_s16 + $0xe8] sm:$0xff]  ;;  %v3204_v42 = vld [vmem:[#allocation2 + $0x98] sm:$0xff]   ;;  %v459_v43 = vld [vmem:[%s3720_s16 + $0xe0] sm:$0xff]  ;;  %s2317_s20 = scalar_lea.sflag [#allocation12], %s3900_s28  ;;  %s3365_s17 = scalar_lea.vmem %s3985_s15, 4096 }
  0x8a   : > { %3044 = vmatprep.subr.bf16.mxu1 %v3187_v6  ;;  %2607 = vmatprep.subr.bf16.mxu0 %v3187_v6  ;;  %v520_v35 = vunpack.c.l.s8.bf16 %v460_v32  ;;  %v436_v36 = vld [vmem:[%s3720_s16 + $0x28] sm:$0xff]  ;;  %v3205_v45 = vld [vmem:[#allocation2 + $0xe0] sm:$0xff]   ;;  %v1108_v47 = vld [vmem:[%s3731_s22 + $0x18] sm:$0xff]  ;;  %v519_v48 = vunpack.c.l.s8.bf16 %v459_v43  ;;  %v524_v52 = vunpack.c.h.s8.bf16 %v460_v32  ;;  %v523_v0 = vunpack.c.h.s8.bf16 %v459_v43  ;;  %p3366_p11 = scmp.ne.s32.totalorder %s3985_s15, %s3365_s17  ;;  %p4176_p13 = scmp.ne.s32.totalorder %s4163_s19, 0 }
  0x8b   : > { %815 = vmatprep.mubr.bf16.mxu0 %v464_v26  ;;  %v472_v40 = vunpack.c.l.s8.bf16 %v436_v36  ;;  %1139 = vperm.xlu0 %3179, %v1105_v39   ;;  %v1106_v44 = vld [vmem:[%s3731_s22 + $0x8] sm:$0xff]  ;;  %v3206_v46 = vld [vmem:[#allocation2 + $0xa0] sm:$0xff]   ;;  %v3209_v56 = vld [vmem:[#allocation2 + $0xf0] sm:$0xff]   ;;  %v476_v58 = vunpack.c.h.s8.bf16 %v436_v36 }
  0x8c   : > { %1149 = vperm.xlu1 %3180, %v1107_v41   ;;  %v3207_v49 = vld [vmem:[#allocation2 + $0xe8] sm:$0xff]   ;;  %v435_v50 = vld [vmem:[%s3720_s16 + $0x20] sm:$0xff]  ;;  %v434_v57 = vld [vmem:[%s3720_s16 + $0x18] sm:$0xff]  ;;  %p3367_p1 = pnand %p3366_p11, %p4176_p13 }
  0x8d   : > { %3052 = vmatpush3.bf16.msra.mxu1 %v3188_v7  ;;  %2608 = vmatpush3.bf16.msra.mxu0 %v3188_v7  ;;  %v1109_v51 = vld [vmem:[%s3731_s22 + $0x20] sm:$0xff]  ;;  %v1110_v53 = vld [vmem:[%s3731_s22 + $0x28] sm:$0xff]  ;;  %v471_v55 = vunpack.c.l.s8.bf16 %v435_v50  ;;  %v1111_v59 = vld [vmem:[%s3731_s22 + $0x30] sm:$0xff]  ;;  %v466_v2 = vunpack.c.l.s8.bf16 %v434_v57  ;;  %v475_v4 = vunpack.c.h.s8.bf16 %v435_v50 }
  0x8e   : > { %3045 = vmatprep.subr.bf16.mxu1 %v3189_v8  ;;  %2609 = vmatprep.subr.bf16.mxu0 %v3189_v8  ;;  %v3208_v54 = vld [vmem:[#allocation2 + $0xa8] sm:$0xff]   ;;  %v1112_v60 = vld [vmem:[%s3731_s22 + $0x38] sm:$0xff]  ;;  %v3210_v61 = vld [vmem:[#allocation2 + $0xb0] sm:$0xff]   ;;  %p3368_p6 = pneg %p3367_p1 }
  0x8f   : > { %1144 = vperm.xlu0 %3179, %v1106_v44   ;;  %v440_v62 = vld [vmem:[%s3720_s16 + $0x48] sm:$0xff]  ;;  %v1113_v63 = vld [vmem:[%s3731_s22 + $0x40] sm:$0xff]  ;;  %v3211_v1 = vld [vmem:[#allocation2 + $0xf8] sm:$0xff]  }
  0x90   : > { %1154 = vperm.xlu1 %3180, %v1108_v47   ;;  %v1114_v3 = vld [vmem:[%s3731_s22 + $0x48] sm:$0xff]  ;;  %v480_v5 = vunpack.c.l.s8.bf16 %v440_v62  ;;  %v3212_v6 = vld [vmem:[#allocation2 + $0xb8] sm:$0xff]   ;;  %v433_v7 = vld [vmem:[%s3720_s16 + $0x10] sm:$0xff] }
  0x91   : > { %3053 = vmatpush3.bf16.msra.mxu1 %v3190_v9  ;;  %2610 = vmatpush3.bf16.msra.mxu0 %v3190_v9  ;;  %v1115_v8 = vld [vmem:[%s3731_s22 + $0x50] sm:$0xff]  ;;  %v1116_v9 = vld [vmem:[%s3731_s22 + $0x58] sm:$0xff]  ;;  %v439_v11 = vld [vmem:[%s3720_s16 + $0x40] sm:$0xff] }
  0x92   : > { %3046 = vmatprep.subr.bf16.mxu1 %v3191_v10  ;;  %2611 = vmatprep.subr.bf16.mxu0 %v3191_v10  ;;  %v465_v10 = vunpack.c.l.s8.bf16 %v433_v7  ;;  %v1117_v12 = vld [vmem:[%s3731_s22 + $0x60] sm:$0xff]  ;;  %v479_v15 = vunpack.c.l.s8.bf16 %v439_v11  ;;  %v1120_v19 = vld [vmem:[%s3731_s22 + $0x78] sm:$0xff]  ;;  %v1122_v25 = vld [vmem:[%s3731_s22 + $0x88] sm:$0xff] }
  0x93   : > { %1159 = vperm.xlu0 %3179, %v1109_v51   ;;  %v1123_v28 = vld [vmem:[%s3731_s22 + $0x90] sm:$0xff]  ;;  %v1128_v39 = vld [vmem:[%s3731_s22 + $0xb8] sm:$0xff]  ;;  %v1129_v43 = vld [vmem:[%s3731_s22 + $0xc0] sm:$0xff] }
  0x94   : > { %1164 = vperm.xlu1 %3180, %v1110_v53   ;;  %v441_v47 = vld [vmem:[%s3720_s16 + $0x50] sm:$0xff]  ;;  %v447_v51 = vld [vmem:[%s3720_s16 + $0x80] sm:$0xff] }
  0x95   : > { %3054 = vmatpush3.bf16.msra.mxu1 %v3192_v13  ;;  %2612 = vmatpush3.bf16.msra.mxu0 %v3192_v13  ;;  %v470_v13 = vunpack.c.h.s8.bf16 %v434_v57  ;;  %v481_v50 = vunpack.c.l.s8.bf16 %v441_v47  ;;  %v1133_v53 = vld [vmem:[%s3731_s22 + $0xe0] sm:$0xff]  ;;  %v1135_v57 = vld [vmem:[%s3731_s22 + $0xf0] sm:$0xff] }
  0x96   : > { %3047 = vmatprep.subr.bf16.mxu1 %v3193_v14  ;;  %2613 = vmatprep.subr.bf16.mxu0 %v3193_v14  ;;  %v1118_v14 = vld [vmem:[%s3731_s22 + $0x68] sm:$0xff] }
  0x97   : > { %1169 = vperm.xlu0 %3179, %v1111_v59   ;;  %v1136_v59 = vld [vmem:[%s3731_s22 + $0xf8] sm:$0xff] }
  0x98   : > { %1174 = vperm.xlu1 %3180, %v1112_v60   ;;  %v485_v60 = vunpack.c.h.s8.bf16 %v441_v47 }
  0x99   : > { %3055 = vmatpush3.bf16.msra.mxu1 %v3194_v16  ;;  %2614 = vmatpush3.bf16.msra.mxu0 %v3194_v16  ;;  %v1119_v16 = vld [vmem:[%s3731_s22 + $0x70] sm:$0xff] }
  0x9a   : > { %3048 = vmatprep.subr.bf16.mxu1 %v3195_v17  ;;  %2615 = vmatprep.subr.bf16.mxu0 %v3195_v17  ;;  %v438_v17 = vld [vmem:[%s3720_s16 + $0x38] sm:$0xff] }
  0x9b   : > { %1179 = vperm.xlu0 %3179, %v1113_v63   ;;  %v478_v32 = vunpack.c.h.s8.bf16 %v438_v17  ;;  %v499_v63 = vunpack.c.h.s8.bf16 %v447_v51 }
  0x9c   : > { %1184 = vperm.xlu1 %3180, %v1114_v3   ;;  %v451_v3 = vld [vmem:[%s3720_s16 + $0xa0] sm:$0xff] }
  0x9d   : > { %3056 = vmatpush3.bf16.msra.mxu1 %v3196_v18  ;;  %2616 = vmatpush3.bf16.msra.mxu0 %v3196_v18  ;;  %v484_v18 = vunpack.c.h.s8.bf16 %v440_v62  ;;  %v452_v62 = vld [vmem:[%s3720_s16 + $0xa8] sm:$0xff] }
  0x9e   : > { %2713 = vmatprep.subr.bf16.mxu1 %v3197_v20  ;;  %v469_v20 = vunpack.c.h.s8.bf16 %v433_v7  ;;  %v450_v7 = vld [vmem:[%s3720_s16 + $0x98] sm:$0xff] }
  0x9f   : > { %1189 = vperm.xlu0 %3179, %v1115_v8  }
  0xa0   : > { %912 = vmatmul.mubr.bf16.vlgmr.msra.gmra.mrb[0].mxu1 %v511_v21  ;;  %816 = vmatmul.mubr.bf16.vlgmr.msra.gmra.mrb[0].mxu0 %v463_v30  ;;  %v474_v21 = vunpack.c.l.s8.bf16 %v438_v17 }
  0xa1   : > { %2714 = vmatpush3.bf16.msra.mxu1 %v3198_v23  ;;  %919 = vmatprep.mubr.bf16.mxu1 %v516_v22  ;;  %v444_v22 = vld [vmem:[%s3720_s16 + $0x68] sm:$0xff]  ;;  %v1121_v23 = vld [vmem:[%s3731_s22 + $0x80] sm:$0xff] }
  0xa2   : > { %2715 = vmatprep.subr.bf16.mxu1 %v3199_v24  ;;  %823 = vmatprep.mubr.bf16.mxu0 %v468_v27  ;;  %v483_v24 = vunpack.c.h.s8.bf16 %v439_v11  ;;  %v488_v26 = vunpack.c.l.s8.bf16 %v444_v22  ;;  %v437_v27 = vld [vmem:[%s3720_s16 + $0x30] sm:$0xff]  ;;  %v492_v36 = vunpack.c.h.s8.bf16 %v444_v22 }
  0xa3   : > { %1194 = vperm.xlu1 %3180, %v1116_v9   ;;  %1199 = vperm.xlu0 %3179, %v1117_v12   ;;  %v473_v30 = vunpack.c.l.s8.bf16 %v437_v27  ;;  %v498_v9 = vunpack.c.l.s8.bf16 %v450_v7  ;;  %v449_v11 = vld [vmem:[%s3720_s16 + $0x90] sm:$0xff] }
  0xa4   : > { %v497_v12 = vunpack.c.l.s8.bf16 %v449_v11  ;;  %v3215_v22 = vld [vmem:[#allocation7 + $0x10] sm:$0xff]  }
  0xa5   : > { %2716 = vmatpush3.bf16.msra.mxu1 %v3200_v29  ;;  %v1124_v29 = vld [vmem:[%s3731_s22 + $0x98] sm:$0xff] }
  0xa6   : > { %2717 = vmatprep.subr.bf16.mxu1 %v3201_v31  ;;  %v443_v31 = vld [vmem:[%s3720_s16 + $0x60] sm:$0xff] }
  0xa7   : > { %1204 = vperm.xlu1 %3180, %v1118_v14   ;;  %1209 = vperm.xlu0 %3179, %v1119_v16   ;;  %v491_v44 = vunpack.c.h.s8.bf16 %v443_v31  ;;  %v3213_v14 = vld [vmem:[#allocation7] sm:$0xff]   ;;  %v501_v16 = vunpack.c.h.s8.bf16 %v449_v11 }
  0xa8   : > { %920 = vmatmul.mubr.bf16.gmra.mrb[4].mxu1 %v515_v33  ;;  %824 = vmatmul.mubr.bf16.gmra.mrb[4].mxu0 %v467_v38  ;;  %v1125_v33 = vld [vmem:[%s3731_s22 + $0xa0] sm:$0xff]  ;;  %v442_v38 = vld [vmem:[%s3720_s16 + $0x58] sm:$0xff] }
  0xa9   : > { %2718 = vmatpush3.bf16.msra.mxu1 %v3202_v34  ;;  %927 = vmatprep.mubr.bf16.mxu1 %v520_v35  ;;  %v487_v34 = vunpack.c.l.s8.bf16 %v443_v31  ;;  %v1126_v35 = vld [vmem:[%s3731_s22 + $0xa8] sm:$0xff]  ;;  %v482_v41 = vunpack.c.l.s8.bf16 %v442_v38 }
  0xaa   : > { %2719 = vmatprep.subr.bf16.mxu1 %v3203_v37  ;;  %831 = vmatprep.mubr.bf16.mxu0 %v472_v40  ;;  %v1127_v37 = vld [vmem:[%s3731_s22 + $0xb0] sm:$0xff]  ;;  %v477_v40 = vunpack.c.h.s8.bf16 %v437_v27  ;;  %v3217_v27 = vld [vmem:[#allocation7 + $0x20] sm:$0xff]  }
  0xab   : > { %1214 = vperm.xlu1 %3180, %v1120_v19   ;;  %1219 = vperm.xlu0 %3179, %v1121_v23   ;;  %v3214_v19 = vld [vmem:[#allocation7 + $0x8] sm:$0xff]   ;;  %v3216_v23 = vld [vmem:[#allocation7 + $0x18] sm:$0xff]  }
  0xac   : > { %2897 = vmatprep.subr.bf16.mxu0 %v3213_v14 }
  0xad   : > { %2720 = vmatpush3.bf16.msra.mxu1 %v3204_v42  ;;  %v448_v42 = vld [vmem:[%s3720_s16 + $0x88] sm:$0xff]  ;;  %2898 = vmatpush3.bf16.msra.mxu0 %v3213_v14 }
  0xae   : > { %2721 = vmatprep.subr.bf16.mxu1 %v3205_v45  ;;  %v1130_v45 = vld [vmem:[%s3731_s22 + $0xc8] sm:$0xff]  ;;  %2899 = vmatprep.subr.bf16.mxu0 %v3214_v19 }
  0xaf   : > { %1224 = vperm.xlu1 %3180, %v1122_v25   ;;  %1229 = vperm.xlu0 %3179, %v1123_v28   ;;  %v457_v28 = vld [vmem:[%s3720_s16 + $0xd0] sm:$0xff] }
  0xb0   : > { %928 = vmatmul.mubr.bf16.gmra.mrb[8].mxu1 %v519_v48  ;;  %832 = vmatmul.mubr.bf16.gmra.mrb[8].mxu0 %v471_v55  ;;  %v1131_v48 = vld [vmem:[%s3731_s22 + $0xd0] sm:$0xff]  ;;  %v1134_v55 = vld [vmem:[%s3731_s22 + $0xe8] sm:$0xff] }
  0xb1   : > { %2722 = vmatpush3.bf16.msra.mxu1 %v3206_v46  ;;  %935 = vmatprep.mubr.bf16.mxu1 %v524_v52  ;;  %v496_v46 = vunpack.c.l.s8.bf16 %v448_v42  ;;  %v486_v52 = vunpack.c.h.s8.bf16 %v442_v38 }
  0xb2   : > { %2723 = vmatprep.subr.bf16.mxu1 %v3207_v49  ;;  %839 = vmatprep.mubr.bf16.mxu0 %v476_v58  ;;  %v1132_v49 = vld [vmem:[%s3731_s22 + $0xd8] sm:$0xff]  ;;  %s3480_s22 = smov [#allocation11]  }
  0xb3   : > { %1234 = vperm.xlu1 %3180, %v1124_v29   ;;  %1239 = vperm.xlu0 %3179, %v1125_v33   ;;  %v446_v58 = vld [vmem:[%s3720_s16 + $0x78] sm:$0xff]  ;;  %v3218_v29 = vld [vmem:[#allocation7 + $0x28] sm:$0xff]   ;;  %s3369_s25 = sshll.u32 %s3480_s22, 4  ;;  %s3370_s25 = int_to_ptr.vmem [resolvable:$false] %s3369_s25 }
  0xb4   : > { %2900 = vmatpush3.bf16.msra.mxu0 %v3214_v19  ;;  %v3220_v33 = vld [vmem:[#allocation7 + $0x38] sm:$0xff]   ;;  %s3371_s27 = scalar_lea.vmem %s3370_s25, 8192  ;;  %p3372_p9 = scmp.lt.s32.totalorder %s3985_s15, %s3370_s25 }
  0xb5   : > { %2724 = vmatpush3.bf16.msra.mxu1 %v3208_v54  ;;  %v495_v54 = vunpack.c.l.s8.bf16 %v447_v51  ;;  %2901 = vmatprep.subr.bf16.mxu0 %v3215_v22  ;;  %p3373_p5 = scmp.lt.s32.totalorder %s3371_s27, %s3365_s17 }
  0xb6   : > { %2725 = vmatprep.subr.bf16.mxu1 %v3209_v56  ;;  %v500_v56 = vunpack.c.h.s8.bf16 %v448_v42 }
  0xb7   : > { %1244 = vperm.xlu1 %3180, %v1126_v35   ;;  %1249 = vperm.xlu0 %3179, %v1127_v37   ;;  %v517_v35 = vunpack.c.h.s8.bf16 %v457_v28  ;;  %v461_v37 = vld [vmem:[%s3720_s16 + $0xf0] sm:$0xff]  ;;  %p3374_p0 = por %p3373_p5, %p3372_p9 }
  0xb8   : > { %936 = vmatmul.mubr.bf16.gmra.mrb[12].mxu1 %v523_v0  ;;  %840 = vmatmul.mubr.bf16.gmra.mrb[12].mxu0 %v475_v4  ;;  %v504_v0 = vunpack.c.l.s8.bf16 %v452_v62  ;;  %v494_v4 = vunpack.c.h.s8.bf16 %v446_v58  ;;  %v521_v38 = vunpack.c.l.s8.bf16 %v461_v37 }
  0xb9   : > { %2726 = vmatpush3.bf16.msra.mxu1 %v3210_v61  ;;  %976 = vmatprep.mubr.bf16.mxu1 %v466_v2  ;;  %v490_v61 = vunpack.c.l.s8.bf16 %v446_v58  ;;  %p3375_p10 = pnand %p3374_p0, %p3368_p6 }
  0xba   : > { %2727 = vmatprep.subr.bf16.mxu1 %v3211_v1  ;;  %847 = vmatprep.mubr.bf16.mxu0 %v480_v5  ;;  %v445_v1 = vld [vmem:[%s3720_s16 + $0x70] sm:$0xff]  ;;  %v503_v5 = vunpack.c.l.s8.bf16 %v451_v3 }
  0xbb   : > { %1254 = vperm.xlu1 %3180, %v1128_v39   ;;  %1259 = vperm.xlu0 %3179, %v1129_v43   ;;  %v489_v2 = vunpack.c.l.s8.bf16 %v445_v1  ;;  %v493_v8 = vunpack.c.h.s8.bf16 %v445_v1 }
  0xbc   : > { %2902 = vmatpush3.bf16.msra.mxu0 %v3215_v22 }
  0xbd   : > { %2728 = vmatpush3.bf16.msra.mxu1 %v3212_v6  ;;  %v508_v6 = vunpack.c.h.s8.bf16 %v452_v62  ;;  %2903 = vmatprep.subr.bf16.mxu0 %v3216_v23 }
  0xbf   : > { %1264 = vperm.xlu1 %3180, %v1130_v45   ;;  %1269 = vperm.xlu0 %3179, %v1131_v48  }
  0xc0   : > { %977 = vmatmul.mubr.bf16.vlgmr.msra.gmra.mrb[16].mxu1 %v465_v10  ;;  %848 = vmatmul.mubr.bf16.gmra.mrb[16].mxu0 %v479_v15  ;;  %v507_v10 = vunpack.c.h.s8.bf16 %v451_v3  ;;  %v454_v15 = vld [vmem:[%s3720_s16 + $0xb8] sm:$0xff] }
  0xc1   : > { %984 = vmatprep.mubr.bf16.mxu1 %v470_v13  ;;  %855 = vmatprep.mubr.bf16.mxu0 %v484_v18  ;;  %v502_v13 = vunpack.c.h.s8.bf16 %v450_v7  ;;  %v506_v17 = vunpack.c.l.s8.bf16 %v454_v15  ;;  %v453_v18 = vld [vmem:[%s3720_s16 + $0xb0] sm:$0xff] }
  0xc2   : > { %v509_v25 = vunpack.c.h.s8.bf16 %v453_v18  ;;  %2904 = vmatpush3.bf16.msra.mxu0 %v3216_v23 }
  0xc3   : > { %1274 = vperm.xlu1 %3180, %v1132_v49   ;;  %1279 = vperm.xlu0 %3179, %v1133_v53  }
  0xc4   : > { %2905 = vmatprep.subr.bf16.mxu0 %v3217_v27 }
  0xc6   : > { %2906 = vmatpush3.bf16.msra.mxu0 %v3217_v27 }
  0xc7   : > { %1284 = vperm.xlu1 %3180, %v1134_v55   ;;  %1289 = vperm.xlu0 %3179, %v1135_v57  }
  0xc8   : > { %985 = vmatmul.mubr.bf16.gmra.mrb[20].mxu1 %v469_v20  ;;  %856 = vmatmul.mubr.bf16.gmra.mrb[20].mxu0 %v483_v24  ;;  %v505_v20 = vunpack.c.l.s8.bf16 %v453_v18  ;;  %v458_v24 = vld [vmem:[%s3720_s16 + $0xd8] sm:$0xff] }
  0xc9   : > { %992 = vmatprep.mubr.bf16.mxu1 %v474_v21  ;;  %863 = vmatprep.mubr.bf16.mxu0 %v488_v26  ;;  %v510_v21 = vunpack.c.h.s8.bf16 %v454_v15  ;;  %v514_v26 = vunpack.c.l.s8.bf16 %v458_v24  ;;  %v518_v31 = vunpack.c.h.s8.bf16 %v458_v24 }
  0xca   : > { %2907 = vmatprep.subr.bf16.mxu0 %v3218_v29 }
  0xcb   : > { %1294 = vperm.xlu1 %3180, %v1136_v59   ;;  %2908 = vmatpush3.bf16.msra.mxu0 %v3218_v29 }
  0xd0   : > { %993 = vmatmul.mubr.bf16.gmra.mrb[24].mxu1 %v473_v30  ;;  %864 = vmatmul.mubr.bf16.gmra.mrb[24].mxu0 %v487_v34  ;;  %v513_v30 = vunpack.c.l.s8.bf16 %v457_v28  ;;  %v462_v34 = vld [vmem:[%s3720_s16 + $0xf8] sm:$0xff] }
  0xd1   : > { %1000 = vmatprep.mubr.bf16.mxu1 %v478_v32  ;;  %871 = vmatprep.mubr.bf16.mxu0 %v492_v36  ;;  %v3219_v32 = vld [vmem:[#allocation7 + $0x30] sm:$0xff]   ;;  %v522_v36 = vunpack.c.l.s8.bf16 %v462_v34  ;;  %v526_v39 = vunpack.c.h.s8.bf16 %v462_v34 }
  0xd2   : > { %2909 = vmatprep.subr.bf16.mxu0 %v3219_v32 }
  0xd3   : > { %2910 = vmatpush3.bf16.msra.mxu0 %v3219_v32 }
  0xd4   : > { %2911 = vmatprep.subr.bf16.mxu0 %v3220_v33 }
  0xd7   : > { %2912 = vmatpush3.bf16.msra.mxu0 %v3220_v33 }
  0xd8   : > { %1001 = vmatmul.mubr.bf16.gmra.mrb[28].mxu1 %v477_v40  ;;  %872 = vmatmul.mubr.bf16.gmra.mrb[28].mxu0 %v491_v44  ;;  %v525_v40 = vunpack.c.h.s8.bf16 %v461_v37 }
  0xd9   : > { %1008 = vmatprep.mubr.bf16.mxu1 %v482_v41  ;;  %879 = vmatprep.mubr.bf16.mxu0 %v496_v46  ;;  %v3792_v41 = vld [vmem:[#allocation5] sm:$0xff]  }
  0xda   : > { %2945 = vmatprep.subr.bf16.mxu0 %v3792_v41 }
  0xe0   : > { %1009 = vmatmul.mubr.bf16.gmra.mrb[32].mxu1 %v481_v50  ;;  %880 = vmatmul.mubr.bf16.gmra.mrb[32].mxu0 %v495_v54 }
  0xe1   : > { %1016 = vmatprep.mubr.bf16.mxu1 %v486_v52  ;;  %887 = vmatprep.mubr.bf16.mxu0 %v500_v56 }
  0xe8   : > { %1017 = vmatmul.mubr.bf16.gmra.mrb[36].mxu1 %v485_v60  ;;  %888 = vmatmul.mubr.bf16.gmra.mrb[36].mxu0 %v499_v63 }
  0xe9   : > { %1024 = vmatprep.mubr.bf16.mxu1 %v490_v61  ;;  %895 = vmatprep.mubr.bf16.mxu0 %v504_v0 }
  0xf0   : > { %1025 = vmatmul.mubr.bf16.gmra.mrb[40].mxu1 %v489_v2  ;;  %896 = vmatmul.mubr.bf16.gmra.mrb[40].mxu0 %v503_v5 }
  0xf1   : > { %1032 = vmatprep.mubr.bf16.mxu1 %v494_v4  ;;  %903 = vmatprep.mubr.bf16.mxu0 %v508_v6 }
  0xf8   : > { %1033 = vmatmul.mubr.bf16.gmra.mrb[44].mxu1 %v493_v8  ;;  %904 = vmatmul.mubr.bf16.gmra.mrb[44].mxu0 %v507_v10 }
  0xf9   : > { %1040 = vmatprep.mubr.bf16.mxu1 %v498_v9 }
 0x100   : > { %1041 = vmatmul.mubr.bf16.gmra.mrb[48].mxu1 %v497_v12 }
 0x101   : > { %1048 = vmatprep.mubr.bf16.mxu1 %v502_v13 }
 0x108   : > { %1049 = vmatmul.mubr.bf16.gmra.mrb[52].mxu1 %v501_v16 }
 0x109   : > { %1056 = vmatprep.mubr.bf16.mxu1 %v506_v17 }
 0x110   : > { %1057 = vmatmul.mubr.bf16.gmra.mrb[56].mxu1 %v505_v20 }
 0x111   : > { %1064 = vmatprep.mubr.bf16.mxu1 %v510_v21 }
 0x118   : > { %1065 = vmatmul.mubr.bf16.gmra.mrb[60].mxu1 %v509_v25  ;;  %v1140_v25 = vpop.permute.xlu0 %1139 }
 0x119   : > { %1072 = vmatprep.mubr.bf16.mxu1 %v514_v26 }
 0x120   : > { %1073 = vmatmul.mubr.bf16.gmra.mrb[64].mxu1 %v513_v30 }
 0x121   : > { %1080 = vmatprep.mubr.bf16.mxu1 %v518_v31 }
 0x128   : > { %1081 = vmatmul.mubr.bf16.gmra.mrb[68].mxu1 %v517_v35 }
 0x129   : > { %1088 = vmatprep.mubr.bf16.mxu1 %v522_v36  ;;  %v1145_v36 = vpop.permute.xlu0 %1144 }
 0x130   : > { %1089 = vmatmul.mubr.bf16.gmra.mrb[72].mxu1 %v521_v38 }
 0x131   : > { %1096 = vmatprep.mubr.bf16.mxu1 %v526_v39 }
 0x138   : > { %1097 = vmatmul.mubr.bf16.gmra.mrb[76].mxu1 %v525_v40 }
 0x173   : > { %v2689_v42 = vpop.f32.mrb[0].mxu1  ;;  %v2617_v47 = vpop.f32.mrb[0].mxu0 }
 0x174   : > { %v2690_v43 = vpop.f32.mrb[1].mxu1  ;;  %v2618_v49 = vpop.f32.mrb[1].mxu0 }
 0x175   : > { %v3795_v44 = vadd.f32 %v2690_v43, %v2689_v42  ;;  %v2692_v45 = vpop.f32.mrb[2].mxu1  ;;  %v2619_v50 = vadd.f32 %v2618_v49, %v2617_v47  ;;  %v2620_v51 = vpop.f32.mrb[2].mxu0 }
 0x176   : > { %v2693_v46 = vpop.f32.mrb[3].mxu1  ;;  %v2621_v52 = vpop.f32.mrb[3].mxu0 }
 0x177   : > { %v3797_v48 = vadd.f32 %v2693_v46, %v2692_v45  ;;  %v2622_v53 = vadd.f32 %v2621_v52, %v2620_v51  ;;  %v1150_v47 = vpop.permute.xlu1 %1149 }
 0x17b   : > { %v2695_v54 = vpop.f32.mrb[4].mxu1  ;;  %v2623_v59 = vpop.f32.mrb[4].mxu0 }
 0x17c   : > { %v2696_v55 = vpop.f32.mrb[5].mxu1  ;;  %v2624_v61 = vpop.f32.mrb[5].mxu0 }
 0x17d   : > { %v3799_v56 = vadd.f32 %v2696_v55, %v2695_v54  ;;  %v2698_v57 = vpop.f32.mrb[6].mxu1  ;;  %v2625_v62 = vadd.f32 %v2624_v61, %v2623_v59  ;;  %v2626_v63 = vpop.f32.mrb[6].mxu0 }
 0x17e   : > { %v2699_v58 = vpop.f32.mrb[7].mxu1  ;;  %v2627_v0 = vpop.f32.mrb[7].mxu0 }
 0x17f   : > { %v3801_v60 = vadd.f32 %v2699_v58, %v2698_v57  ;;  %v2628_v1 = vadd.f32 %v2627_v0, %v2626_v63 }
 0x183   : > { %v2701_v2 = vpop.f32.mrb[8].mxu1  ;;  %v2629_v7 = vpop.f32.mrb[8].mxu0 }
 0x184   : > { %v2702_v3 = vpop.f32.mrb[9].mxu1  ;;  %v2630_v9 = vpop.f32.mrb[9].mxu0 }
 0x185   : > { %v3803_v4 = vadd.f32 %v2702_v3, %v2701_v2  ;;  %v2704_v5 = vpop.f32.mrb[10].mxu1  ;;  %v3807_v10 = vadd.f32 %v2630_v9, %v2629_v7  ;;  %v2632_v11 = vpop.f32.mrb[10].mxu0 }
 0x186   : > { %v2705_v6 = vpop.f32.mrb[11].mxu1  ;;  %v2633_v12 = vpop.f32.mrb[11].mxu0 }
 0x187   : > { %v3805_v8 = vadd.f32 %v2705_v6, %v2704_v5  ;;  %v3809_v13 = vadd.f32 %v2633_v12, %v2632_v11  ;;  %v1155_v2 = vpop.permute.xlu1 %1154 }
 0x18b   : > { %v2707_v14 = vpop.f32.mrb[12].mxu1  ;;  %v2635_v19 = vpop.f32.mrb[12].mxu0 }
 0x18c   : > { %v2708_v15 = vpop.f32.mrb[13].mxu1  ;;  %v2636_v21 = vpop.f32.mrb[13].mxu0 }
 0x18d   : > { %v3811_v16 = vadd.f32 %v2708_v15, %v2707_v14  ;;  %v2710_v17 = vpop.f32.mrb[14].mxu1  ;;  %v3815_v22 = vadd.f32 %v2636_v21, %v2635_v19  ;;  %v2638_v23 = vpop.f32.mrb[14].mxu0  ;;  %v3222_v15 = vld [vmem:[#allocation5 + $0x8] sm:$0xff]  }
 0x18e   : > { %v2711_v18 = vpop.f32.mrb[15].mxu1  ;;  %v2639_v24 = vpop.f32.mrb[15].mxu0 }
 0x18f   : > { %v3813_v20 = vadd.f32 %v2711_v18, %v2710_v17  ;;  %v3817_v26 = vadd.f32 %v2639_v24, %v2638_v23 }
 0x193   : > { %v2729_v27 = vpop.f32.mrb[16].mxu1  ;;  %v2641_v32 = vpop.f32.mrb[16].mxu0 }
 0x194   : > { %v2730_v28 = vpop.f32.mrb[17].mxu1  ;;  %v2642_v35 = vpop.f32.mrb[17].mxu0 }
 0x195   : > { %v2731_v29 = vadd.f32 %v2730_v28, %v2729_v27  ;;  %v2732_v30 = vpop.f32.mrb[18].mxu1  ;;  %v3820_v37 = vadd.f32 %v2642_v35, %v2641_v32  ;;  %v2644_v38 = vpop.f32.mrb[18].mxu0  ;;  %v3223_v27 = vld [vmem:[#allocation5 + $0x10] sm:$0xff]  }
 0x196   : > { %v2733_v31 = vpop.f32.mrb[19].mxu1  ;;  %v2645_v40 = vpop.f32.mrb[19].mxu0 }
 0x197   : > { %v979_v33 = vadd.f32 %v2731_v29, %v2619_v50  ;;  %v2734_v34 = vadd.f32 %v2733_v31, %v2732_v30  ;;  %v3822_v42 = vadd.f32 %v2645_v40, %v2644_v38  ;;  %v1160_v28 = vpop.permute.xlu0 %1159  ;;  %v1165_v29 = vpop.permute.xlu1 %1164  ;;  %v3224_v38 = vld [vmem:[#allocation5 + $0x18] sm:$0xff]  }
 0x199   : > { %v982_v39 = vadd.f32 %v2734_v34, %v2622_v53  ;;  %v1297_v43 = vmul.f32 %v1140_v25, %v979_v33 }
 0x19b   : > { %v1298_v45 = vmul.f32 %v1145_v36, %v982_v39  ;;  %v2735_v46 = vpop.f32.mrb[20].mxu1  ;;  %v2647_v55 = vpop.f32.mrb[20].mxu0 }
 0x19c   : > { %v2736_v49 = vpop.f32.mrb[21].mxu1  ;;  %v2648_v53 = vpop.f32.mrb[21].mxu0 }
 0x19d   : > { %v1382_v50 = vpack.c.bf16 %v1298_v45, %v1297_v43  ;;  %v2737_v51 = vadd.f32 %v2736_v49, %v2735_v46  ;;  %v2738_v52 = vpop.f32.mrb[22].mxu1  ;;  %v3826_v59 = vadd.f32 %v2648_v53, %v2647_v55  ;;  %v2650_v61 = vpop.f32.mrb[22].mxu0 }
 0x19e   : > { %v2739_v54 = vpop.f32.mrb[23].mxu1  ;;  %v2651_v0 = vpop.f32.mrb[23].mxu0 }
 0x19f   : > { %v987_v57 = vadd.f32 %v2737_v51, %v2625_v62  ;;  %v2740_v58 = vadd.f32 %v2739_v54, %v2738_v52  ;;  %2913 = vmatprep.mubr.bf16.mxu0 %v1382_v50  ;;  %v3828_v3 = vadd.f32 %v2651_v0, %v2650_v61  ;;  %v3225_v50 = vld [vmem:[#allocation5 + $0x20] sm:$0xff]   ;;  %v1170_v51 = vpop.permute.xlu0 %1169  ;;  %v1175_v52 = vpop.permute.xlu1 %1174  ;;  %v3226_v0 = vld [vmem:[#allocation5 + $0x28] sm:$0xff]  }
 0x1a1   : > { %v990_v63 = vadd.f32 %v2740_v58, %v2628_v1  ;;  %v1299_v5 = vmul.f32 %v1150_v47, %v987_v57 }
 0x1a3   : > { %v1300_v6 = vmul.f32 %v1155_v2, %v990_v63  ;;  %v2741_v7 = vpop.f32.mrb[24].mxu1  ;;  %v2653_v17 = vpop.f32.mrb[24].mxu0 }
 0x1a4   : > { %v2742_v9 = vpop.f32.mrb[25].mxu1  ;;  %v2654_v21 = vpop.f32.mrb[25].mxu0 }
 0x1a5   : > { %v1383_v11 = vpack.c.bf16 %v1300_v6, %v1299_v5  ;;  %v2743_v12 = vadd.f32 %v2742_v9, %v2741_v7  ;;  %v2744_v14 = vpop.f32.mrb[26].mxu1  ;;  %v3831_v1 = vadd.f32 %v2654_v21, %v2653_v17  ;;  %v2656_v23 = vpop.f32.mrb[26].mxu0 }
 0x1a6   : > { %v2745_v62 = vpop.f32.mrb[27].mxu1  ;;  %v2657_v25 = vpop.f32.mrb[27].mxu0 }
 0x1a7   : > { %v995_v18 = vadd.f32 %v2743_v12, %v3807_v10  ;;  %v2746_v19 = vadd.f32 %v2745_v62, %v2744_v14  ;;  %2914 = vmatmul.mubr.bf16.vlgmr.msra.gmra.mrb[48].mxu0 %v1383_v11  ;;  %v3835_v30 = vadd.f32 %v2657_v25, %v2656_v23  ;;  %v1180_v62 = vpop.permute.xlu0 %1179  ;;  %v1185_v17 = vpop.permute.xlu1 %1184 }
 0x1a8   : > { %2946 = vmatpush3.bf16.msra.mxu0 %v3792_v41 }
 0x1a9   : > { %v998_v24 = vadd.f32 %v2746_v19, %v3809_v13  ;;  %2947 = vmatprep.subr.bf16.mxu0 %v3222_v15  ;;  %v1301_v31 = vmul.f32 %v1160_v28, %v995_v18  ;;  %v3228_v28 = vld [vmem:[#allocation5 + $0x38] sm:$0xff]  }
 0x1ab   : > { %v1302_v32 = vmul.f32 %v1165_v29, %v998_v24  ;;  %v2747_v10 = vpop.f32.mrb[28].mxu1  ;;  %v2659_v39 = vpop.f32.mrb[28].mxu0 }
 0x1ac   : > { %v2748_v33 = vpop.f32.mrb[29].mxu1  ;;  %2948 = vmatpush3.bf16.msra.mxu0 %v3222_v15  ;;  %v2660_v43 = vpop.f32.mrb[29].mxu0  ;;  %v3227_v15 = vld [vmem:[#allocation5 + $0x30] sm:$0xff]  }
 0x1ad   : > { %v2749_v34 = vadd.f32 %v2748_v33, %v2747_v10  ;;  %v2750_v35 = vpop.f32.mrb[30].mxu1  ;;  %v1384_v36 = vpack.c.bf16 %v1302_v32, %v1301_v31  ;;  %2949 = vmatprep.subr.bf16.mxu0 %v3223_v27  ;;  %v3838_v45 = vadd.f32 %v2660_v43, %v2659_v39  ;;  %v2662_v46 = vpop.f32.mrb[30].mxu0 }
 0x1ae   : > { %v2751_v41 = vpop.f32.mrb[31].mxu1  ;;  %v2663_v49 = vpop.f32.mrb[31].mxu0 }
 0x1af   : > { %v1003_v13 = vadd.f32 %v2749_v34, %v3815_v22  ;;  %v2752_v40 = vadd.f32 %v2751_v41, %v2750_v35  ;;  %2917 = vmatprep.mubr.bf16.mxu0 %v1384_v36  ;;  %v3841_v54 = vadd.f32 %v2663_v49, %v2662_v46  ;;  %v1195_v41 = vpop.permute.xlu1 %1194 }
 0x1b0   : > { %2950 = vmatpush3.bf16.msra.mxu0 %v3223_v27 }
 0x1b1   : > { %v1006_v47 = vadd.f32 %v2752_v40, %v3817_v26  ;;  %2951 = vmatprep.subr.bf16.mxu0 %v3224_v38  ;;  %v1303_v55 = vmul.f32 %v1170_v51, %v1003_v13 }
 0x1b3   : > { %v1304_v57 = vmul.f32 %v1175_v52, %v1006_v47  ;;  %v2753_v58 = vpop.f32.mrb[32].mxu1  ;;  %v2665_v5 = vpop.f32.mrb[32].mxu0 }
 0x1b4   : > { %v2754_v22 = vpop.f32.mrb[33].mxu1  ;;  %2952 = vmatpush3.bf16.msra.mxu0 %v3224_v38  ;;  %v2666_v7 = vpop.f32.mrb[33].mxu0 }
 0x1b5   : > { %v2755_v53 = vadd.f32 %v2754_v22, %v2753_v58  ;;  %v2756_v61 = vpop.f32.mrb[34].mxu1  ;;  %v1385_v63 = vpack.c.bf16 %v1304_v57, %v1303_v55  ;;  %2953 = vmatprep.subr.bf16.mxu0 %v3225_v50  ;;  %v3844_v9 = vadd.f32 %v2666_v7, %v2665_v5  ;;  %v2668_v11 = vpop.f32.mrb[34].mxu0 }
 0x1b6   : > { %v2757_v2 = vpop.f32.mrb[35].mxu1  ;;  %v2669_v14 = vpop.f32.mrb[35].mxu0 }
 0x1b7   : > { %v1011_v26 = vadd.f32 %v2755_v53, %v3820_v37  ;;  %v2758_v6 = vadd.f32 %v2757_v2, %v2756_v61  ;;  %2918 = vmatmul.mubr.bf16.gmra.mrb[52].mxu0 %v1385_v63  ;;  %v3847_v18 = vadd.f32 %v2669_v14, %v2668_v11  ;;  %v1190_v38 = vpop.permute.xlu0 %1189  ;;  %v1205_v63 = vpop.permute.xlu1 %1204 }
 0x1b8   : > { %2954 = vmatpush3.bf16.msra.mxu0 %v3225_v50 }
 0x1b9   : > { %v1014_v12 = vadd.f32 %v2758_v6, %v3822_v42  ;;  %2955 = vmatprep.subr.bf16.mxu0 %v3226_v0  ;;  %v1305_v19 = vmul.f32 %v1180_v62, %v1011_v26 }
 0x1bb   : > { %v1306_v21 = vmul.f32 %v1185_v17, %v1014_v12  ;;  %v2759_v23 = vpop.f32.mrb[36].mxu1  ;;  %v2671_v31 = vpop.f32.mrb[36].mxu0 }
 0x1bc   : > { %v2760_v37 = vpop.f32.mrb[37].mxu1  ;;  %2956 = vmatpush3.bf16.msra.mxu0 %v3226_v0  ;;  %v2672_v10 = vpop.f32.mrb[37].mxu0 }
 0x1bd   : > { %v2761_v24 = vadd.f32 %v2760_v37, %v2759_v23  ;;  %v2762_v25 = vpop.f32.mrb[38].mxu1  ;;  %v1386_v27 = vpack.c.bf16 %v1306_v21, %v1305_v19  ;;  %2957 = vmatprep.subr.bf16.mxu0 %v3227_v15  ;;  %v3850_v33 = vadd.f32 %v2672_v10, %v2671_v31  ;;  %v2674_v34 = vpop.f32.mrb[38].mxu0 }
 0x1be   : > { %v2763_v29 = vpop.f32.mrb[39].mxu1  ;;  %v2675_v36 = vpop.f32.mrb[39].mxu0 }
 0x1bf   : > { %v1019_v42 = vadd.f32 %v2761_v24, %v3826_v59  ;;  %v2764_v32 = vadd.f32 %v2763_v29, %v2762_v25  ;;  %2921 = vmatprep.mubr.bf16.mxu0 %v1386_v27  ;;  %v3853_v39 = vadd.f32 %v2675_v36, %v2674_v34  ;;  %v1200_v61 = vpop.permute.xlu0 %1199  ;;  %v1215_v24 = vpop.permute.xlu1 %1214  ;;  %v3245_v36 = vld [vmem:[#allocation8] sm:$0xff]  }
 0x1c0   : > { %2958 = vmatpush3.bf16.msra.mxu0 %v3227_v15  ;;  %2993 = vmatprep.subr.bf16.mxu1 %v3245_v36 }
 0x1c1   : > { %v1022_v35 = vadd.f32 %v2764_v32, %v3828_v3  ;;  %2959 = vmatprep.subr.bf16.mxu0 %v3228_v28  ;;  %v1307_v13 = vmul.f32 %v1190_v38, %v1019_v42  ;;  %v3246_v38 = vld [vmem:[#allocation8 + $0x8] sm:$0xff]   ;;  %2994 = vmatpush3.bf16.msra.mxu1 %v3245_v36 }
 0x1c2   : > { %2995 = vmatprep.subr.bf16.mxu1 %v3246_v38 }
 0x1c3   : > { %v1308_v40 = vmul.f32 %v1195_v41, %v1022_v35  ;;  %v2765_v43 = vpop.f32.mrb[40].mxu1  ;;  %v2677_v51 = vpop.f32.mrb[40].mxu0 }
 0x1c4   : > { %v2766_v46 = vpop.f32.mrb[41].mxu1  ;;  %2960 = vmatpush3.bf16.msra.mxu0 %v3228_v28  ;;  %v2678_v3 = vpop.f32.mrb[41].mxu0 }
 0x1c5   : > { %v2767_v59 = vadd.f32 %v2766_v46, %v2765_v43  ;;  %v2768_v47 = vpop.f32.mrb[42].mxu1  ;;  %v1387_v49 = vpack.c.bf16 %v1308_v40, %v1307_v13  ;;  %v3856_v57 = vadd.f32 %v2678_v3, %v2677_v51  ;;  %v2680_v58 = vpop.f32.mrb[42].mxu0  ;;  %2996 = vmatpush3.bf16.msra.mxu1 %v3246_v38 }
 0x1c6   : > { %v2769_v50 = vpop.f32.mrb[43].mxu1  ;;  %v2681_v53 = vpop.f32.mrb[43].mxu0 }
 0x1c7   : > { %v1027_v52 = vadd.f32 %v2767_v59, %v3831_v1  ;;  %v2770_v55 = vadd.f32 %v2769_v50, %v2768_v47  ;;  %2922 = vmatmul.mubr.bf16.gmra.mrb[56].mxu0 %v1387_v49  ;;  %v3859_v0 = vadd.f32 %v2681_v53, %v2680_v58  ;;  %v1210_v37 = vpop.permute.xlu0 %1209  ;;  %v1225_v13 = vpop.permute.xlu1 %1224  ;;  %v3247_v59 = vld [vmem:[#allocation8 + $0x10] sm:$0xff]  }
 0x1c8   : > { %2997 = vmatprep.subr.bf16.mxu1 %v3247_v59 }
 0x1c9   : > { %v1030_v22 = vadd.f32 %v2770_v55, %v3835_v30  ;;  %v1309_v2 = vmul.f32 %v1200_v61, %v1027_v52  ;;  %2998 = vmatpush3.bf16.msra.mxu1 %v3247_v59 }
 0x1cb   : > { %v1310_v5 = vmul.f32 %v1205_v63, %v1030_v22  ;;  %v2771_v26 = vpop.f32.mrb[44].mxu1  ;;  %v2683_v14 = vpop.f32.mrb[44].mxu0 }
 0x1cc   : > { %v2772_v6 = vpop.f32.mrb[45].mxu1  ;;  %v2684_v17 = vpop.f32.mrb[45].mxu0 }
 0x1cd   : > { %v2773_v7 = vadd.f32 %v2772_v6, %v2771_v26  ;;  %v2774_v11 = vpop.f32.mrb[46].mxu1  ;;  %v1388_v1 = vpack.c.bf16 %v1310_v5, %v1309_v2  ;;  %v3862_v30 = vadd.f32 %v2684_v17, %v2683_v14  ;;  %v2686_v19 = vpop.f32.mrb[46].mxu0  ;;  %v3249_v2 = vld [vmem:[#allocation8 + $0x20] sm:$0xff]  }
 0x1ce   : > { %v2775_v12 = vpop.f32.mrb[47].mxu1  ;;  %v2687_v23 = vpop.f32.mrb[47].mxu0 }
 0x1cf   : > { %v1035_v15 = vadd.f32 %v2773_v7, %v3838_v45  ;;  %v2776_v62 = vadd.f32 %v2775_v12, %v2774_v11  ;;  %2925 = vmatprep.mubr.bf16.mxu0 %v1388_v1  ;;  %v3865_v25 = vadd.f32 %v2687_v23, %v2686_v19  ;;  %v1220_v41 = vpop.permute.xlu0 %1219  ;;  %v1235_v22 = vpop.permute.xlu1 %1234 }
 0x1d1   : > { %v1038_v21 = vadd.f32 %v2776_v62, %v3841_v54  ;;  %v1311_v27 = vmul.f32 %v1210_v37, %v1035_v15 }
 0x1d3   : > { %v1312_v28 = vmul.f32 %v1215_v24, %v1038_v21  ;;  %v2777_v29 = vpop.f32.mrb[48].mxu1  ;;  %v1230_v58 = vpop.permute.xlu0 %1229  ;;  %v3251_v21 = vld [vmem:[#allocation8 + $0x30] sm:$0xff]  }
 0x1d4   : > { %v2778_v31 = vpop.f32.mrb[49].mxu1  ;;  %v1245_v15 = vpop.permute.xlu1 %1244 }
 0x1d5   : > { %v2779_v42 = vadd.f32 %v2778_v31, %v2777_v29  ;;  %v2780_v32 = vpop.f32.mrb[50].mxu1  ;;  %v1389_v45 = vpack.c.bf16 %v1312_v28, %v1311_v27 }
 0x1d6   : > { %v2781_v10 = vpop.f32.mrb[51].mxu1 }
 0x1d7   : > { %v1043_v34 = vadd.f32 %v2779_v42, %v3844_v9  ;;  %v2782_v35 = vadd.f32 %v2781_v10, %v2780_v32  ;;  %2926 = vmatmul.mubr.bf16.gmra.mrb[60].mxu0 %v1389_v45  ;;  %v1240_v14 = vpop.permute.xlu0 %1239 }
 0x1d8   : > { %v1255_v32 = vpop.permute.xlu1 %1254 }
 0x1d9   : > { %v1046_v54 = vadd.f32 %v2782_v35, %v3847_v18  ;;  %v1313_v40 = vmul.f32 %v1220_v41, %v1043_v34  ;;  %v3248_v18 = vld [vmem:[#allocation8 + $0x18] sm:$0xff]  }
 0x1da   : > { %2999 = vmatprep.subr.bf16.mxu1 %v3248_v18 }
 0x1db   : > { %v1314_v43 = vmul.f32 %v1225_v13, %v1046_v54  ;;  %v2783_v46 = vpop.f32.mrb[52].mxu1  ;;  %3000 = vmatpush3.bf16.msra.mxu1 %v3248_v18  ;;  %v1250_v42 = vpop.permute.xlu0 %1249 }
 0x1dc   : > { %v2784_v47 = vpop.f32.mrb[53].mxu1  ;;  %3001 = vmatprep.subr.bf16.mxu1 %v3249_v2 }
 0x1dd   : > { %v2785_v49 = vadd.f32 %v2784_v47, %v2783_v46  ;;  %v2786_v50 = vpop.f32.mrb[54].mxu1  ;;  %v1390_v51 = vpack.c.bf16 %v1314_v43, %v1313_v40  ;;  %v1265_v43 = vpop.permute.xlu1 %1264 }
 0x1de   : > { %v2787_v9 = vpop.f32.mrb[55].mxu1 }
 0x1df   : > { %v1051_v52 = vadd.f32 %v2785_v49, %v3850_v33  ;;  %v2788_v55 = vadd.f32 %v2787_v9, %v2786_v50  ;;  %2929 = vmatprep.mubr.bf16.mxu0 %v1390_v51  ;;  %3002 = vmatpush3.bf16.msra.mxu1 %v3249_v2 }
 0x1e1   : > { %v1054_v3 = vadd.f32 %v2788_v55, %v3853_v39  ;;  %v1315_v53 = vmul.f32 %v1230_v58, %v1051_v52  ;;  %v3250_v39 = vld [vmem:[#allocation8 + $0x28] sm:$0xff]   ;;  %v1275_v58 = vpop.permute.xlu1 %1274 }
 0x1e2   : > { %3003 = vmatprep.subr.bf16.mxu1 %v3250_v39 }
 0x1e3   : > { %v1316_v61 = vmul.f32 %v1235_v22, %v1054_v3  ;;  %v2789_v63 = vpop.f32.mrb[56].mxu1  ;;  %3004 = vmatpush3.bf16.msra.mxu1 %v3250_v39 }
 0x1e4   : > { %v2790_v5 = vpop.f32.mrb[57].mxu1  ;;  %3005 = vmatprep.subr.bf16.mxu1 %v3251_v21 }
 0x1e5   : > { %v2791_v26 = vadd.f32 %v2790_v5, %v2789_v63  ;;  %v2792_v6 = vpop.f32.mrb[58].mxu1  ;;  %v1391_v7 = vpack.c.bf16 %v1316_v61, %v1315_v53 }
 0x1e6   : > { %v2793_v11 = vpop.f32.mrb[59].mxu1 }
 0x1e7   : > { %v1059_v33 = vadd.f32 %v2791_v26, %v3856_v57  ;;  %v2794_v1 = vadd.f32 %v2793_v11, %v2792_v6  ;;  %2930 = vmatmul.mubr.bf16.gmra.mrb[64].mxu0 %v1391_v7  ;;  %3006 = vmatpush3.bf16.msra.mxu1 %v3251_v21 }
 0x1e9   : > { %v1062_v12 = vadd.f32 %v2794_v1, %v3859_v0  ;;  %v1317_v62 = vmul.f32 %v1240_v14, %v1059_v33  ;;  %v3252_v0 = vld [vmem:[#allocation8 + $0x38] sm:$0xff]   ;;  %v1285_v33 = vpop.permute.xlu1 %1284 }
 0x1ea   : > { %3007 = vmatprep.subr.bf16.mxu1 %v3252_v0 }
 0x1eb   : > { %v1318_v17 = vmul.f32 %v1245_v15, %v1062_v12  ;;  %v2795_v19 = vpop.f32.mrb[60].mxu1  ;;  %3008 = vmatpush3.bf16.msra.mxu1 %v3252_v0  ;;  %v3234_v0 = vld [vmem:[%s3824_s23 + $0x28] sm:$0xff]  }
 0x1ec   : > { %v2796_v23 = vpop.f32.mrb[61].mxu1 }
 0x1ed   : > { %v2797_v37 = vadd.f32 %v2796_v23, %v2795_v19  ;;  %v2798_v24 = vpop.f32.mrb[62].mxu1  ;;  %v1392_v27 = vpack.c.bf16 %v1318_v17, %v1317_v62  ;;  %v1295_v23 = vpop.permute.xlu1 %1294 }
 0x1ee   : > { %v2799_v28 = vpop.f32.mrb[63].mxu1 }
 0x1ef   : > { %v1067_v57 = vadd.f32 %v2797_v37, %v3862_v30  ;;  %v2800_v29 = vadd.f32 %v2799_v28, %v2798_v24  ;;  %2933 = vmatprep.mubr.bf16.mxu0 %v1392_v27  ;;  %v3229_v27 = vld [vmem:[%s3824_s23] sm:$0xff]  }
 0x1f1   : > { %v1070_v31 = vadd.f32 %v2800_v29, %v3865_v25  ;;  %v1319_v45 = vmul.f32 %v1250_v42, %v1067_v57  ;;  %v1260_v25 = vpop.permute.xlu0 %1259  ;;  %v3230_v57 = vld [vmem:[%s3824_s23 + $0x8] sm:$0xff]   ;;  %v3232_v29 = vld [vmem:[%s3824_s23 + $0x18] sm:$0xff]  }
 0x1f2   : > { %v3236_v42 = vld [vmem:[%s3824_s23 + $0x38] sm:$0xff]  }
 0x1f3   : > { %v1320_v10 = vmul.f32 %v1255_v32, %v1070_v31  ;;  %v2801_v34 = vpop.f32.mrb[64].mxu1  ;;  %v3235_v31 = vld [vmem:[%s3824_s23 + $0x30] sm:$0xff]   ;;  %v3237_v32 = vld [vmem:[%s3824_s23 + $0x40] sm:$0xff]  }
 0x1f4   : > { %v2802_v35 = vpop.f32.mrb[65].mxu1 }
 0x1f5   : > { %v2803_v36 = vadd.f32 %v2802_v35, %v2801_v34  ;;  %v2804_v38 = vpop.f32.mrb[66].mxu1  ;;  %v1393_v54 = vpack.c.bf16 %v1320_v10, %v1319_v45  ;;  %v1270_v3 = vpop.permute.xlu0 %1269  ;;  %v3238_v45 = vld [vmem:[%s3824_s23 + $0x48] sm:$0xff]   ;;  %v3239_v10 = vld [vmem:[%s3824_s23 + $0x50] sm:$0xff]   ;;  %v3240_v34 = vld [vmem:[%s3824_s23 + $0x58] sm:$0xff]  }
 0x1f6   : > { %v2805_v41 = vpop.f32.mrb[67].mxu1  ;;  %v3241_v35 = vld [vmem:[%s3824_s23 + $0x60] sm:$0xff]  }
 0x1f7   : > { %v1075_v30 = vadd.f32 %v2803_v36, %v3795_v44  ;;  %v2806_v13 = vadd.f32 %v2805_v41, %v2804_v38  ;;  %2934 = vmatmul.mubr.bf16.gmra.mrb[68].mxu0 %v1393_v54  ;;  %v3242_v36 = vld [vmem:[%s3824_s23 + $0x68] sm:$0xff]   ;;  %v3243_v38 = vld [vmem:[%s3824_s23 + $0x70] sm:$0xff]   ;;  %v3244_v54 = vld [vmem:[%s3824_s23 + $0x78] sm:$0xff]  }
 0x1f8   : > { %v3905_v41 = vld [vmem:[%s4146_s5] ss:$0 sm:$0xff] }
 0x1f9   : > { %v1078_v40 = vadd.f32 %v2806_v13, %v3797_v48  ;;  %v1321_v46 = vmul.f32 %v1260_v25, %v1075_v30  ;;  %v1280_v11 = vpop.permute.xlu0 %1279 }
 0x1fb   : > { %v1322_v59 = vmul.f32 %v1265_v43, %v1078_v40  ;;  %v2807_v47 = vpop.f32.mrb[68].mxu1 }
 0x1fc   : > { %v2808_v49 = vpop.f32.mrb[69].mxu1 }
 0x1fd   : > { %v2809_v50 = vadd.f32 %v2808_v49, %v2807_v47  ;;  %v2810_v51 = vpop.f32.mrb[70].mxu1  ;;  %v1394_v9 = vpack.c.bf16 %v1322_v59, %v1321_v46  ;;  %v1290_v21 = vpop.permute.xlu0 %1289 }
 0x1fe   : > { %v2811_v52 = vpop.f32.mrb[71].mxu1 }
 0x1ff   : > { %v1083_v55 = vadd.f32 %v2809_v50, %v3799_v56  ;;  %v2812_v18 = vadd.f32 %v2811_v52, %v2810_v51  ;;  %2937 = vmatprep.mubr.bf16.mxu0 %v1394_v9 }
 0x201   : > { %v1086_v44 = vadd.f32 %v2812_v18, %v3801_v60  ;;  %v1323_v22 = vmul.f32 %v1270_v3, %v1083_v55 }
 0x203   : > { %v1324_v48 = vmul.f32 %v1275_v58, %v1086_v44  ;;  %v2813_v53 = vpop.f32.mrb[72].mxu1 }
 0x204   : > { %v2814_v61 = vpop.f32.mrb[73].mxu1 }
 0x205   : > { %v2815_v63 = vadd.f32 %v2814_v61, %v2813_v53  ;;  %v2816_v2 = vpop.f32.mrb[74].mxu1  ;;  %v1395_v5 = vpack.c.bf16 %v1324_v48, %v1323_v22 }
 0x206   : > { %v2817_v26 = vpop.f32.mrb[75].mxu1 }
 0x207   : > { %v1091_v6 = vadd.f32 %v2815_v63, %v3803_v4  ;;  %v2818_v7 = vadd.f32 %v2817_v26, %v2816_v2  ;;  %2938 = vmatmul.mubr.bf16.gmra.mrb[72].mxu0 %v1395_v5 }
 0x209   : > { %v1094_v56 = vadd.f32 %v2818_v7, %v3805_v8  ;;  %v1325_v1 = vmul.f32 %v1280_v11, %v1091_v6 }
 0x20b   : > { %v1326_v60 = vmul.f32 %v1285_v33, %v1094_v56  ;;  %v2819_v39 = vpop.f32.mrb[76].mxu1 }
 0x20c   : > { %v2820_v12 = vpop.f32.mrb[77].mxu1 }
 0x20d   : > { %v2821_v14 = vadd.f32 %v2820_v12, %v2819_v39  ;;  %v2822_v15 = vpop.f32.mrb[78].mxu1  ;;  %v1396_v62 = vpack.c.bf16 %v1326_v60, %v1325_v1 }
 0x20e   : > { %v2823_v17 = vpop.f32.mrb[79].mxu1 }
 0x20f   : > { %v1099_v19 = vadd.f32 %v2821_v14, %v3811_v16  ;;  %v2824_v4 = vadd.f32 %v2823_v17, %v2822_v15  ;;  %2941 = vmatprep.mubr.bf16.mxu0 %v1396_v62  ;;  %v3231_v16 = vld [vmem:[%s3824_s23 + $0x10] sm:$0xff]  }
 0x211   : > { %v1102_v8 = vadd.f32 %v2824_v4, %v3813_v20  ;;  %v1327_v37 = vmul.f32 %v1290_v21, %v1099_v19  ;;  %v3233_v20 = vld [vmem:[%s3824_s23 + $0x20] sm:$0xff]  }
 0x213   : > { %v1328_v24 = vmul.f32 %v1295_v23, %v1102_v8 }
 0x215   : > { %v1397_v28 = vpack.c.bf16 %v1328_v24, %v1327_v37 }
 0x217   : > { %2942 = vmatmul.mubr.bf16.gmra.mrb[76].mxu0 %v1397_v28 }
 0x218   : > { %2961 = vmatprep.mubr.bf16.mxu0 %v3229_v27 }
 0x21f   : > { %2962 = vmatmul.mubr.bf16.vlgmr.msra.gmra.mrb[48].mxu0 %v3230_v57 }
 0x220   : > { %2965 = vmatprep.mubr.bf16.mxu0 %v3231_v16 }
 0x227   : > { %2966 = vmatmul.mubr.bf16.gmra.mrb[52].mxu0 %v3232_v29 }
 0x228   : > { %2969 = vmatprep.mubr.bf16.mxu0 %v3233_v20 }
 0x22f   : > { %2970 = vmatmul.mubr.bf16.gmra.mrb[56].mxu0 %v3234_v0 }
 0x230   : > { %2973 = vmatprep.mubr.bf16.mxu0 %v3235_v31 }
 0x237   : > { %2974 = vmatmul.mubr.bf16.gmra.mrb[60].mxu0 %v3236_v42 }
 0x238   : > { %2977 = vmatprep.mubr.bf16.mxu0 %v3237_v32 }
 0x23f   : > { %2978 = vmatmul.mubr.bf16.gmra.mrb[64].mxu0 %v3238_v45 }
 0x240   : > { %2981 = vmatprep.mubr.bf16.mxu0 %v3239_v10 }
 0x247   : > { %2982 = vmatmul.mubr.bf16.gmra.mrb[68].mxu0 %v3240_v34 }
 0x248   : > { %2985 = vmatprep.mubr.bf16.mxu0 %v3241_v35 }
 0x24f   : > { %2986 = vmatmul.mubr.bf16.gmra.mrb[72].mxu0 %v3242_v36 }
 0x250   : > { %2989 = vmatprep.mubr.bf16.mxu0 %v3243_v38 }
 0x257   : > { %2990 = vmatmul.mubr.bf16.gmra.mrb[76].mxu0 %v3244_v54 }
 0x2f2   : > { %v2963_v30 = vpop.f32.mrb[48].mxu0 }
 0x2f3   : > { %v1937_v13 = vadd.f32 %v2963_v30, %v3905_v41  ;;  %v1801_v40 = vpop.f32.mrb[49].mxu0 }
 0x2f4   : > { %v1935_v25 = vadd.f32 %v3905_v41, %v1801_v40  ;;  %v2964_v43 = vpop.f32.mrb[50].mxu0 }
 0x2f5   : > { %v1969_v46 = vmax.f32 %v1937_v13, 0.0  ;;  %v1938_v59 = vadd.f32 %v2964_v43, %v3905_v41  ;;  %v1804_v47 = vpop.f32.mrb[51].mxu0 }
 0x2f6   : > { %v1967_v49 = vmax.f32 %v1935_v25, 0.0  ;;  %v1936_v50 = vadd.f32 %v3905_v41, %v1804_v47 }
 0x2f7   : > { %2001 = vst [vmem:[%s3914_s21 + $0x10] sm:$0xff] %v1969_v46  ;;  %v1970_v51 = vmax.f32 %v1938_v59, 0.0 }
 0x2f8   : > { %1999 = vst [vmem:[%s3914_s21] sm:$0xff] %v1967_v49  ;;  %v1968_v9 = vmax.f32 %v1936_v50, 0.0 }
 0x2f9   : > { %2002 = vst [vmem:[%s3914_s21 + $0x18] sm:$0xff] %v1970_v51  ;;  %v2032_v52 = vpack.c.bf16 %v1970_v51, %v1969_v46 }
 0x2fa   : > { %2000 = vst [vmem:[%s3914_s21 + $0x8] sm:$0xff] %v1968_v9  ;;  %v2031_v55 = vpack.c.bf16 %v1968_v9, %v1967_v49  ;;  %v2967_v18 = vpop.f32.mrb[52].mxu0 }
 0x2fb   : > { %v1941_v44 = vadd.f32 %v2967_v18, %v3905_v41  ;;  %v1817_v3 = vpop.f32.mrb[53].mxu0 }
 0x2fc   : > { %v1939_v58 = vadd.f32 %v3905_v41, %v1817_v3  ;;  %v2968_v22 = vpop.f32.mrb[54].mxu0  ;;  %3009 = vmatprep.mubr.bf16.mxu1 %v2031_v55 }
 0x2fd   : > { %v1973_v48 = vmax.f32 %v1941_v44, 0.0  ;;  %v1942_v53 = vadd.f32 %v2968_v22, %v3905_v41  ;;  %v1820_v61 = vpop.f32.mrb[55].mxu0  ;;  %3010 = vmatmul.mubr.bf16.vlgmr.msra.gmra.mrb[80].mxu1 %v2032_v52 }
 0x2fe   : > { %v1971_v63 = vmax.f32 %v1939_v58, 0.0  ;;  %v1940_v2 = vadd.f32 %v3905_v41, %v1820_v61 }
 0x2ff   : > { %2005 = vst [vmem:[%s3914_s21 + $0x30] sm:$0xff] %v1973_v48  ;;  %v1974_v5 = vmax.f32 %v1942_v53, 0.0 }
 0x300   : > { %2003 = vst [vmem:[%s3914_s21 + $0x20] sm:$0xff] %v1971_v63  ;;  %v1972_v26 = vmax.f32 %v1940_v2, 0.0 }
 0x301   : > { %2006 = vst [vmem:[%s3914_s21 + $0x38] sm:$0xff] %v1974_v5  ;;  %v2034_v6 = vpack.c.bf16 %v1974_v5, %v1973_v48 }
 0x302   : > { %2004 = vst [vmem:[%s3914_s21 + $0x28] sm:$0xff] %v1972_v26  ;;  %v2033_v7 = vpack.c.bf16 %v1972_v26, %v1971_v63  ;;  %v2971_v56 = vpop.f32.mrb[56].mxu0 }
 0x303   : > { %v1945_v11 = vadd.f32 %v2971_v56, %v3905_v41  ;;  %v1833_v33 = vpop.f32.mrb[57].mxu0 }
 0x304   : > { %v1943_v1 = vadd.f32 %v3905_v41, %v1833_v33  ;;  %v2972_v60 = vpop.f32.mrb[58].mxu0  ;;  %3013 = vmatprep.mubr.bf16.mxu1 %v2033_v7 }
 0x305   : > { %v1977_v39 = vmax.f32 %v1945_v11, 0.0  ;;  %v1946_v12 = vadd.f32 %v2972_v60, %v3905_v41  ;;  %v1836_v14 = vpop.f32.mrb[59].mxu0  ;;  %3014 = vmatmul.mubr.bf16.gmra.mrb[84].mxu1 %v2034_v6 }
 0x306   : > { %v1975_v15 = vmax.f32 %v1943_v1, 0.0  ;;  %v1944_v62 = vadd.f32 %v3905_v41, %v1836_v14 }
 0x307   : > { %2009 = vst [vmem:[%s3914_s21 + $0x50] sm:$0xff] %v1977_v39  ;;  %v1978_v17 = vmax.f32 %v1946_v12, 0.0 }
 0x308   : > { %2007 = vst [vmem:[%s3914_s21 + $0x40] sm:$0xff] %v1975_v15  ;;  %v1976_v19 = vmax.f32 %v1944_v62, 0.0 }
 0x309   : > { %2010 = vst [vmem:[%s3914_s21 + $0x58] sm:$0xff] %v1978_v17  ;;  %v2036_v4 = vpack.c.bf16 %v1978_v17, %v1977_v39 }
 0x30a   : > { %2008 = vst [vmem:[%s3914_s21 + $0x48] sm:$0xff] %v1976_v19  ;;  %v2035_v8 = vpack.c.bf16 %v1976_v19, %v1975_v15  ;;  %v2975_v21 = vpop.f32.mrb[60].mxu0 }
 0x30b   : > { %v1949_v23 = vadd.f32 %v2975_v21, %v3905_v41  ;;  %v1849_v37 = vpop.f32.mrb[61].mxu0 }
 0x30c   : > { %v1947_v24 = vadd.f32 %v3905_v41, %v1849_v37  ;;  %v2976_v27 = vpop.f32.mrb[62].mxu0  ;;  %3017 = vmatprep.mubr.bf16.mxu1 %v2035_v8 }
 0x30d   : > { %v1981_v28 = vmax.f32 %v1949_v23, 0.0  ;;  %v1950_v57 = vadd.f32 %v2976_v27, %v3905_v41  ;;  %v1852_v16 = vpop.f32.mrb[63].mxu0  ;;  %3018 = vmatmul.mubr.bf16.gmra.mrb[88].mxu1 %v2036_v4 }
 0x30e   : > { %v1979_v29 = vmax.f32 %v1947_v24, 0.0  ;;  %v1948_v20 = vadd.f32 %v3905_v41, %v1852_v16 }
 0x30f   : > { %2013 = vst [vmem:[%s3914_s21 + $0x70] sm:$0xff] %v1981_v28  ;;  %v1982_v0 = vmax.f32 %v1950_v57, 0.0 }
 0x310   : > { %2011 = vst [vmem:[%s3914_s21 + $0x60] sm:$0xff] %v1979_v29  ;;  %v1980_v31 = vmax.f32 %v1948_v20, 0.0 }
 0x311   : > { %2014 = vst [vmem:[%s3914_s21 + $0x78] sm:$0xff] %v1982_v0  ;;  %v2038_v42 = vpack.c.bf16 %v1982_v0, %v1981_v28 }
 0x312   : > { %2012 = vst [vmem:[%s3914_s21 + $0x68] sm:$0xff] %v1980_v31  ;;  %v2037_v32 = vpack.c.bf16 %v1980_v31, %v1979_v29  ;;  %v2979_v45 = vpop.f32.mrb[64].mxu0 }
 0x313   : > { %v1953_v10 = vadd.f32 %v2979_v45, %v3905_v41  ;;  %v1865_v34 = vpop.f32.mrb[65].mxu0 }
 0x314   : > { %v1951_v35 = vadd.f32 %v3905_v41, %v1865_v34  ;;  %v2980_v36 = vpop.f32.mrb[66].mxu0  ;;  %3021 = vmatprep.mubr.bf16.mxu1 %v2037_v32 }
 0x315   : > { %v1985_v38 = vmax.f32 %v1953_v10, 0.0  ;;  %v1954_v54 = vadd.f32 %v2980_v36, %v3905_v41  ;;  %v1868_v30 = vpop.f32.mrb[67].mxu0  ;;  %3022 = vmatmul.mubr.bf16.gmra.mrb[92].mxu1 %v2038_v42 }
 0x316   : > { %v1983_v13 = vmax.f32 %v1951_v35, 0.0  ;;  %v1952_v40 = vadd.f32 %v3905_v41, %v1868_v30 }
 0x317   : > { %2017 = vst [vmem:[%s3914_s21 + $0x90] sm:$0xff] %v1985_v38  ;;  %v1986_v25 = vmax.f32 %v1954_v54, 0.0 }
 0x318   : > { %2015 = vst [vmem:[%s3914_s21 + $0x80] sm:$0xff] %v1983_v13  ;;  %v1984_v43 = vmax.f32 %v1952_v40, 0.0 }
 0x319   : > { %2018 = vst [vmem:[%s3914_s21 + $0x98] sm:$0xff] %v1986_v25  ;;  %v2040_v46 = vpack.c.bf16 %v1986_v25, %v1985_v38 }
 0x31a   : > { %2016 = vst [vmem:[%s3914_s21 + $0x88] sm:$0xff] %v1984_v43  ;;  %v2039_v59 = vpack.c.bf16 %v1984_v43, %v1983_v13  ;;  %v2983_v47 = vpop.f32.mrb[68].mxu0 }
 0x31b   : > { %v1957_v49 = vadd.f32 %v2983_v47, %v3905_v41  ;;  %v1881_v50 = vpop.f32.mrb[69].mxu0 }
 0x31c   : > { %v1955_v51 = vadd.f32 %v3905_v41, %v1881_v50  ;;  %v2984_v9 = vpop.f32.mrb[70].mxu0  ;;  %3025 = vmatprep.mubr.bf16.mxu1 %v2039_v59 }
 0x31d   : > { %v1989_v52 = vmax.f32 %v1957_v49, 0.0  ;;  %v1958_v55 = vadd.f32 %v2984_v9, %v3905_v41  ;;  %v1884_v18 = vpop.f32.mrb[71].mxu0  ;;  %3026 = vmatmul.mubr.bf16.gmra.mrb[96].mxu1 %v2040_v46 }
 0x31e   : > { %v1987_v44 = vmax.f32 %v1955_v51, 0.0  ;;  %v1956_v3 = vadd.f32 %v3905_v41, %v1884_v18 }
 0x31f   : > { %2021 = vst [vmem:[%s3914_s21 + $0xb0] sm:$0xff] %v1989_v52  ;;  %v1990_v58 = vmax.f32 %v1958_v55, 0.0 }
 0x320   : > { %2019 = vst [vmem:[%s3914_s21 + $0xa0] sm:$0xff] %v1987_v44  ;;  %v1988_v22 = vmax.f32 %v1956_v3, 0.0 }
 0x321   : > { %2022 = vst [vmem:[%s3914_s21 + $0xb8] sm:$0xff] %v1990_v58  ;;  %v2042_v48 = vpack.c.bf16 %v1990_v58, %v1989_v52 }
 0x322   : > { %2020 = vst [vmem:[%s3914_s21 + $0xa8] sm:$0xff] %v1988_v22  ;;  %v2041_v53 = vpack.c.bf16 %v1988_v22, %v1987_v44  ;;  %v2987_v61 = vpop.f32.mrb[72].mxu0 }
 0x323   : > { %v1961_v63 = vadd.f32 %v2987_v61, %v3905_v41  ;;  %v1897_v2 = vpop.f32.mrb[73].mxu0 }
 0x324   : > { %v1959_v5 = vadd.f32 %v3905_v41, %v1897_v2  ;;  %v2988_v26 = vpop.f32.mrb[74].mxu0  ;;  %3029 = vmatprep.mubr.bf16.mxu1 %v2041_v53 }
 0x325   : > { %v1993_v6 = vmax.f32 %v1961_v63, 0.0  ;;  %v1962_v7 = vadd.f32 %v2988_v26, %v3905_v41  ;;  %v1900_v56 = vpop.f32.mrb[75].mxu0  ;;  %3030 = vmatmul.mubr.bf16.gmra.mrb[100].mxu1 %v2042_v48 }
 0x326   : > { %v1991_v11 = vmax.f32 %v1959_v5, 0.0  ;;  %v1960_v33 = vadd.f32 %v3905_v41, %v1900_v56 }
 0x327   : > { %2025 = vst [vmem:[%s3914_s21 + $0xd0] sm:$0xff] %v1993_v6  ;;  %v1994_v1 = vmax.f32 %v1962_v7, 0.0 }
 0x328   : > { %2023 = vst [vmem:[%s3914_s21 + $0xc0] sm:$0xff] %v1991_v11  ;;  %v1992_v60 = vmax.f32 %v1960_v33, 0.0 }
 0x329   : > { %2026 = vst [vmem:[%s3914_s21 + $0xd8] sm:$0xff] %v1994_v1  ;;  %v2044_v39 = vpack.c.bf16 %v1994_v1, %v1993_v6 }
 0x32a   : > { %2024 = vst [vmem:[%s3914_s21 + $0xc8] sm:$0xff] %v1992_v60  ;;  %v2043_v12 = vpack.c.bf16 %v1992_v60, %v1991_v11  ;;  %v2991_v14 = vpop.f32.mrb[76].mxu0 }
 0x32b   : > { %v1965_v15 = vadd.f32 %v2991_v14, %v3905_v41  ;;  %v1913_v62 = vpop.f32.mrb[77].mxu0 }
 0x32c   : > { %v1963_v17 = vadd.f32 %v3905_v41, %v1913_v62  ;;  %v2992_v19 = vpop.f32.mrb[78].mxu0  ;;  %3033 = vmatprep.mubr.bf16.mxu1 %v2043_v12 }
 0x32d   : > { %v1997_v4 = vmax.f32 %v1965_v15, 0.0  ;;  %v1966_v8 = vadd.f32 %v2992_v19, %v3905_v41  ;;  %v1916_v21 = vpop.f32.mrb[79].mxu0  ;;  %3034 = vmatmul.mubr.bf16.gmra.mrb[104].mxu1 %v2044_v39 }
 0x32e   : > { %v1995_v23 = vmax.f32 %v1963_v17, 0.0  ;;  %v1964_v37 = vadd.f32 %v3905_v41, %v1916_v21 }
 0x32f   : > { %2029 = vst [vmem:[%s3914_s21 + $0xf0] sm:$0xff] %v1997_v4  ;;  %v1998_v24 = vmax.f32 %v1966_v8, 0.0 }
 0x330   : > { %2027 = vst [vmem:[%s3914_s21 + $0xe0] sm:$0xff] %v1995_v23  ;;  %v1996_v27 = vmax.f32 %v1964_v37, 0.0 }
 0x331   : > { %2030 = vst [vmem:[%s3914_s21 + $0xf8] sm:$0xff] %v1998_v24  ;;  %v2046_v28 = vpack.c.bf16 %v1998_v24, %v1997_v4 }
 0x332   : > { %2028 = vst [vmem:[%s3914_s21 + $0xe8] sm:$0xff] %v1996_v27  ;;  %v2045_v57 = vpack.c.bf16 %v1996_v27, %v1995_v23 }
 0x334   : > { %3037 = vmatprep.mubr.bf16.mxu1 %v2045_v57 }
 0x335   : > { %3038 = vmatmul.mubr.bf16.gmra.mrb[108].mxu1 %v2046_v28 }
 0x336   : > { %3378 = shalt.err (!%p3375_p10)
}
 0x337   : > { %s3379_s29 = scalar_lea.hbm %s3982_s11, 4096  ;;  %s3383_s30 = scalar_lea.hbm %s4150_s9, 8192 }
 0x338   : > { %p3380_p2 = scmp.ne.s32.totalorder %s3982_s11, %s3379_s29  ;;  %p3384_p12 = scmp.lt.u32.totalorder %s3982_s11, %s4150_s9 }
 0x339   : > { %p3385_p7 = scmp.lt.u32.totalorder %s3383_s30, %s3379_s29  ;;  %p3387_p11 = scmp.lt.u32.totalorder %s3379_s29, %s3982_s11 }
 0x33a   : > { %p3381_p3 = pnand %p3380_p2, %p4176_p13 }
 0x33b   : > { %p3386_p8 = por %p3385_p7, %p3384_p12 }
 0x33c   : > { %p3382_p4 = pneg %p3381_p3 }
 0x33d   : > { %p3388_p1 = por %p3387_p11, %p3386_p8 }
 0x33f   : > { %p3389_p6 = pnand %p3388_p1, %p3382_p4 }
 0x341   : > { %3392 = shalt.err (!%p3389_p6)
}
 0x342   : > { %s3481_s16 = smov 128   ;;  %s3482_s17 = smov 8   ;;  %v4017_v41 = vld [vmem:[%s4148_s7] ss:$0 sm:$0xff] }
 0x343   : > { %3106 = dma.vmem_to_hbm [thread:$0]  (%p4176_p13), %s3985_s15, 4096, %s3982_s11, %s2317_s20, %s3481_s16, %s3481_s16, %s3482_s17  }
 0x344   : > { %s4023_s27 = scalar_lea.vmem [#allocation10], %s2507_s18  ;;  %s4091_s20 = scalar_lea.hbm %s4149_s8, %s2599_s24 }
 0x345   : > { %s2330_s18 = sshll.u32 %s4023_s27, 4  ;;  %s2312_s29 = scalar_lea.sflag [#allocation4], %s3900_s28  ;;  %s4093_s18 = int_to_ptr.vmem [resolvable:$true] %s2330_s18 }
 0x346   : > { %s3393_s23 = scalar_lea.vmem %s4093_s18, 4096  ;;  %s3483_s26 = smov [#allocation10]  }
 0x347   : > { %p3394_p9 = scmp.ne.s32.totalorder %s4093_s18, %s3393_s23  ;;  %s3397_s13 = sshll.u32 %s3483_s26, 4  ;;  %s3398_s13 = int_to_ptr.vmem [resolvable:$false] %s3397_s13 }
 0x348   : > { %s3399_s30 = scalar_lea.vmem %s3398_s13, 8192  ;;  %p3400_p10 = scmp.lt.s32.totalorder %s4093_s18, %s3398_s13 }
 0x349   : > { %p3395_p5 = pnand %p3394_p9, %p4176_p13  ;;  %p3401_p2 = scmp.lt.s32.totalorder %s3399_s30, %s3393_s23 }
 0x34b   : > { %p3396_p0 = pneg %p3395_p5  ;;  %p3402_p3 = por %p3401_p2, %p3400_p10 }
 0x34d   : > { %p3403_p4 = pnand %p3402_p3, %p3396_p0 }
 0x3d0   : > { %v3011_v16 = vpop.f32.mrb[80].mxu1 }
 0x3d1   : > { %v2161_v29 = vadd.f32 %v3011_v16, %v4017_v41  ;;  %v2152_v20 = vpop.f32.mrb[81].mxu1 }
 0x3d2   : > { %v2153_v0 = vadd.f32 %v4017_v41, %v2152_v20  ;;  %v3012_v31 = vpop.f32.mrb[82].mxu1 }
 0x3d3   : > { %2281 = vst [vmem:[%s4023_s27 + $0x10] sm:$0xff] %v2161_v29  ;;  %v2164_v42 = vadd.f32 %v3012_v31, %v4017_v41  ;;  %v2155_v32 = vpop.f32.mrb[83].mxu1 }
 0x3d4   : > { %2279 = vst [vmem:[%s4023_s27] sm:$0xff] %v2153_v0  ;;  %v2156_v45 = vadd.f32 %v4017_v41, %v2155_v32 }
 0x3d5   : > { %2282 = vst [vmem:[%s4023_s27 + $0x18] sm:$0xff] %v2164_v42 }
 0x3d6   : > { %2280 = vst [vmem:[%s4023_s27 + $0x8] sm:$0xff] %v2156_v45 }
 0x3d8   : > { %v3015_v10 = vpop.f32.mrb[84].mxu1 }
 0x3d9   : > { %v2177_v34 = vadd.f32 %v3015_v10, %v4017_v41  ;;  %v2168_v35 = vpop.f32.mrb[85].mxu1 }
 0x3da   : > { %v2169_v36 = vadd.f32 %v4017_v41, %v2168_v35  ;;  %v3016_v38 = vpop.f32.mrb[86].mxu1 }
 0x3db   : > { %2285 = vst [vmem:[%s4023_s27 + $0x30] sm:$0xff] %v2177_v34  ;;  %v2180_v54 = vadd.f32 %v3016_v38, %v4017_v41  ;;  %v2171_v30 = vpop.f32.mrb[87].mxu1 }
 0x3dc   : > { %2283 = vst [vmem:[%s4023_s27 + $0x20] sm:$0xff] %v2169_v36  ;;  %v2172_v13 = vadd.f32 %v4017_v41, %v2171_v30 }
 0x3dd   : > { %2286 = vst [vmem:[%s4023_s27 + $0x38] sm:$0xff] %v2180_v54 }
 0x3de   : > { %2284 = vst [vmem:[%s4023_s27 + $0x28] sm:$0xff] %v2172_v13 }
 0x3e0   : > { %v3019_v40 = vpop.f32.mrb[88].mxu1 }
 0x3e1   : > { %v2193_v25 = vadd.f32 %v3019_v40, %v4017_v41  ;;  %v2184_v43 = vpop.f32.mrb[89].mxu1 }
 0x3e2   : > { %v2185_v46 = vadd.f32 %v4017_v41, %v2184_v43  ;;  %v3020_v59 = vpop.f32.mrb[90].mxu1 }
 0x3e3   : > { %2289 = vst [vmem:[%s4023_s27 + $0x50] sm:$0xff] %v2193_v25  ;;  %v2196_v47 = vadd.f32 %v3020_v59, %v4017_v41  ;;  %v2187_v49 = vpop.f32.mrb[91].mxu1 }
 0x3e4   : > { %2287 = vst [vmem:[%s4023_s27 + $0x40] sm:$0xff] %v2185_v46  ;;  %v2188_v50 = vadd.f32 %v4017_v41, %v2187_v49 }
 0x3e5   : > { %2290 = vst [vmem:[%s4023_s27 + $0x58] sm:$0xff] %v2196_v47 }
 0x3e6   : > { %2288 = vst [vmem:[%s4023_s27 + $0x48] sm:$0xff] %v2188_v50 }
 0x3e8   : > { %v3023_v51 = vpop.f32.mrb[92].mxu1 }
 0x3e9   : > { %v2209_v9 = vadd.f32 %v3023_v51, %v4017_v41  ;;  %v2200_v52 = vpop.f32.mrb[93].mxu1 }
 0x3ea   : > { %v2201_v55 = vadd.f32 %v4017_v41, %v2200_v52  ;;  %v3024_v18 = vpop.f32.mrb[94].mxu1 }
 0x3eb   : > { %2293 = vst [vmem:[%s4023_s27 + $0x70] sm:$0xff] %v2209_v9  ;;  %v2212_v44 = vadd.f32 %v3024_v18, %v4017_v41  ;;  %v2203_v3 = vpop.f32.mrb[95].mxu1 }
 0x3ec   : > { %2291 = vst [vmem:[%s4023_s27 + $0x60] sm:$0xff] %v2201_v55  ;;  %v2204_v58 = vadd.f32 %v4017_v41, %v2203_v3 }
 0x3ed   : > { %2294 = vst [vmem:[%s4023_s27 + $0x78] sm:$0xff] %v2212_v44 }
 0x3ee   : > { %2292 = vst [vmem:[%s4023_s27 + $0x68] sm:$0xff] %v2204_v58 }
 0x3f0   : > { %v3027_v22 = vpop.f32.mrb[96].mxu1 }
 0x3f1   : > { %v2225_v48 = vadd.f32 %v3027_v22, %v4017_v41  ;;  %v2216_v53 = vpop.f32.mrb[97].mxu1 }
 0x3f2   : > { %v2217_v61 = vadd.f32 %v4017_v41, %v2216_v53  ;;  %v3028_v63 = vpop.f32.mrb[98].mxu1 }
 0x3f3   : > { %2297 = vst [vmem:[%s4023_s27 + $0x90] sm:$0xff] %v2225_v48  ;;  %v2228_v2 = vadd.f32 %v3028_v63, %v4017_v41  ;;  %v2219_v5 = vpop.f32.mrb[99].mxu1 }
 0x3f4   : > { %2295 = vst [vmem:[%s4023_s27 + $0x80] sm:$0xff] %v2217_v61  ;;  %v2220_v26 = vadd.f32 %v4017_v41, %v2219_v5 }
 0x3f5   : > { %2298 = vst [vmem:[%s4023_s27 + $0x98] sm:$0xff] %v2228_v2 }
 0x3f6   : > { %2296 = vst [vmem:[%s4023_s27 + $0x88] sm:$0xff] %v2220_v26 }
 0x3f8   : > { %v3031_v6 = vpop.f32.mrb[100].mxu1 }
 0x3f9   : > { %v2241_v7 = vadd.f32 %v3031_v6, %v4017_v41  ;;  %v2232_v56 = vpop.f32.mrb[101].mxu1 }
 0x3fa   : > { %v2233_v11 = vadd.f32 %v4017_v41, %v2232_v56  ;;  %v3032_v33 = vpop.f32.mrb[102].mxu1 }
 0x3fb   : > { %2301 = vst [vmem:[%s4023_s27 + $0xb0] sm:$0xff] %v2241_v7  ;;  %v2244_v1 = vadd.f32 %v3032_v33, %v4017_v41  ;;  %v2235_v60 = vpop.f32.mrb[103].mxu1 }
 0x3fc   : > { %2299 = vst [vmem:[%s4023_s27 + $0xa0] sm:$0xff] %v2233_v11  ;;  %v2236_v39 = vadd.f32 %v4017_v41, %v2235_v60 }
 0x3fd   : > { %2302 = vst [vmem:[%s4023_s27 + $0xb8] sm:$0xff] %v2244_v1 }
 0x3fe   : > { %2300 = vst [vmem:[%s4023_s27 + $0xa8] sm:$0xff] %v2236_v39 }
 0x400   : > { %v3035_v12 = vpop.f32.mrb[104].mxu1 }
 0x401   : > { %v2257_v14 = vadd.f32 %v3035_v12, %v4017_v41  ;;  %v2248_v15 = vpop.f32.mrb[105].mxu1 }
 0x402   : > { %v2249_v62 = vadd.f32 %v4017_v41, %v2248_v15  ;;  %v3036_v17 = vpop.f32.mrb[106].mxu1 }
 0x403   : > { %2305 = vst [vmem:[%s4023_s27 + $0xd0] sm:$0xff] %v2257_v14  ;;  %v2260_v19 = vadd.f32 %v3036_v17, %v4017_v41  ;;  %v2251_v4 = vpop.f32.mrb[107].mxu1 }
 0x404   : > { %2303 = vst [vmem:[%s4023_s27 + $0xc0] sm:$0xff] %v2249_v62  ;;  %v2252_v8 = vadd.f32 %v4017_v41, %v2251_v4 }
 0x405   : > { %2306 = vst [vmem:[%s4023_s27 + $0xd8] sm:$0xff] %v2260_v19 }
 0x406   : > { %2304 = vst [vmem:[%s4023_s27 + $0xc8] sm:$0xff] %v2252_v8 }
 0x408   : > { %v3039_v21 = vpop.f32.mrb[108].mxu1 }
 0x409   : > { %v2273_v23 = vadd.f32 %v3039_v21, %v4017_v41  ;;  %v2264_v37 = vpop.f32.mrb[109].mxu1 }
 0x40a   : > { %v2265_v24 = vadd.f32 %v4017_v41, %v2264_v37  ;;  %v3040_v27 = vpop.f32.mrb[110].mxu1 }
 0x40b   : > { %2309 = vst [vmem:[%s4023_s27 + $0xf0] sm:$0xff] %v2273_v23  ;;  %v2276_v28 = vadd.f32 %v3040_v27, %v4017_v41  ;;  %v2267_v57 = vpop.f32.mrb[111].mxu1 }
 0x40c   : > { %2307 = vst [vmem:[%s4023_s27 + $0xe0] sm:$0xff] %v2265_v24  ;;  %v2268_v16 = vadd.f32 %v4017_v41, %v2267_v57 }
 0x40d   : > { %2310 = vst [vmem:[%s4023_s27 + $0xf8] sm:$0xff] %v2276_v28 }
 0x40e   : > { %2308 = vst [vmem:[%s4023_s27 + $0xe8] sm:$0xff] %v2268_v16 }
 0x40f   : > { %3406 = shalt.err (!%p3403_p4)
}
 0x410   : > { %s3407_s24 = scalar_lea.hbm %s4091_s20, 4096  ;;  %s3411_s22 = scalar_lea.hbm %s4149_s8, 8192 }
 0x411   : > { %p3408_p12 = scmp.ne.s32.totalorder %s4091_s20, %s3407_s24  ;;  %p3412_p11 = scmp.lt.u32.totalorder %s4091_s20, %s4149_s8 }
 0x412   : > { %p3413_p1 = scmp.lt.u32.totalorder %s3411_s22, %s3407_s24  ;;  %p3415_p9 = scmp.lt.u32.totalorder %s3407_s24, %s4091_s20 }
 0x413   : > { %p3409_p7 = pnand %p3408_p12, %p4176_p13 }
 0x414   : > { %p3414_p6 = por %p3413_p1, %p3412_p11 }
 0x415   : > { %p3410_p8 = pneg %p3409_p7 }
 0x416   : > { %p3416_p5 = por %p3415_p9, %p3414_p6 }
 0x418   : > { %p3417_p0 = pnand %p3416_p5, %p3410_p8 }
 0x41a   : > { %3420 = shalt.err (!%p3417_p0)
}
 0x41b   : > { %3105 = dma.vmem_to_hbm [thread:$0]  (%p4176_p13), %s4093_s18, 4096, %s4091_s20, %s2312_s29, %s3481_s16, %s3481_s16, %s3482_s17  }
 0x41c PF: > { %s4177_s11 = sld [smem:[#allocation18_spill]]  ;;  %s4178_s15 = sld [smem:[#allocation22_spill]] }
 0x41d   : > { %p3137_p10 = scmp.ge.s32.totalorder %s3471_s12, 2 }
 0x422   : > { %s2361_s23 = sand.u32 1, %s4177_s11   ;;  %p4179_p2 = scmp.ne.s32.totalorder %s4178_s15, 0 }
 0x423   : > { %s2362_s26 = scalar_lea.sflag [#allocation4], %s2361_s23 }
 0x424   : > { %p3123_p3 = pnand %p3137_p10, %p4179_p2 }
 0x426   : > { %3450 = dma.done.wait (!%p3123_p3), %s2362_s26, 4096  }
 0x427   : > { %3452 = vsyncadd (!%p3123_p3), %s2362_s26, 4294963200  ;;  %s2371_s19 = scalar_lea.sflag [#allocation12], %s2361_s23 }
 0x428   : > { %3454 = dma.done.wait (!%p3123_p3), %s2371_s19, 4096  }
 0x429   : > { %3456 = vsyncadd (!%p3123_p3), %s2371_s19, 4294963200  ;;  %s4180_s12 = sld [smem:[#allocation20_spill]]  ;;  %s4181_s28 = sld [smem:[#allocation19_spill]] }
 0x42a   : > { %s4182_s11 = sld [smem:[#allocation21_spill]]  ;;  %s4183_s30 = smov %s3463_s10 }
 0x42f   : > { %p26_p13 = scmp.ge.s32.totalorder %s4180_s12, 4   ;;  %s4184_s10 = smov %s4181_s28 }
 0x431   :  { %28 = sbr.rel (!%p26_p13) target bundleno = 8 (0x8), region = 125 }
 0x438   :  { %2376 = vsyncpa [#allocation3], 1 }
 0x439   :  { %2378 = vsyncpa [#allocation3 + $0x1], 1 }
 0x43a   :  { %2379 = vsyncpa [#allocation6], 1 }
 0x43b   :  { %2380 = vsyncpa [#allocation9], 1 }
 0x43c   :  { %2381 = vsyncpa [#allocation4], 1 }
 0x43d   :  { %2383 = vsyncpa [#allocation4 + $0x1], 1 }
 0x43e   :  { %2384 = vsyncpa [#allocation12], 1 }
 0x43f   :  { %2386 = vsyncpa [#allocation12 + $0x1], 1 }

</bundles_post_ra>
